<compile_context>
chip_gen: v5e
topology: v5e:2x2
jax: 0.10.0
libtpu: 0.0.40
codegen_flags: <defaults>
</compile_context>

<pallas_src>
import functools

import jax
import jax.numpy as jnp
from jax.experimental import pallas as pl
from jax.experimental.pallas import tpu as pltpu


def _round_up(x, m):
    return ((x + m - 1) // m) * m


# ----------------------------------------------------------------------------
# Pallas kernel 1: fused  (X @ W) * scale + bias  [+ ReLU]
# ----------------------------------------------------------------------------
def _matmul_affine_kernel(x_ref, w_ref, s_ref, b_ref, o_ref, *, relu):
    # bf16 x bf16 -> f32 on the MXU; epilogue stays f32.
    acc = jnp.dot(x_ref[...], w_ref[...], preferred_element_type=jnp.float32)
    y = acc * s_ref[...] + b_ref[...]
    if relu:
        y = jnp.maximum(y, 0.0)
    o_ref[...] = y.astype(o_ref.dtype)


def matmul_affine_pallas(x, w, scale, bias, relu):
    """x: [M, K], w: [K, N], scale/bias: [N] -> [M, N] f32.

    MXU operands are bf16; N is padded to a 128-lane multiple (lane-dense
    stores) and M is tiled so BlockSpec double-buffering hides HBM DMA.
    """
    M, K = x.shape
    K2, N = w.shape
    assert K == K2

    n_pad = _round_up(max(N, 128), 128)
    # M tile: multiple of 8, sized so a (tm, K) bf16 block stays ~<=2 MiB, which
    # keeps (2 inputs x 2 pipeline buffers) well inside v5e's 16 MiB scoped VMEM
    # and v7x's 32 MiB default, while still being big enough to pipeline well.
    tm = max(8, min(512, ((2 << 20) // (K * 2)) // 8 * 8))
    tm = min(tm, _round_up(M, 8))
    m_pad = _round_up(M, tm)

    xb = jnp.pad(x.astype(jnp.bfloat16), ((0, m_pad - M), (0, 0)))
    wb = jnp.pad(w.astype(jnp.bfloat16), ((0, 0), (0, n_pad - N)))
    s2 = jnp.pad(scale.astype(jnp.float32), (0, n_pad - N),
                 constant_values=1.0).reshape(1, n_pad)
    b2 = jnp.pad(bias.astype(jnp.float32), (0, n_pad - N)).reshape(1, n_pad)

    out = pl.pallas_call(
        functools.partial(_matmul_affine_kernel, relu=relu),
        out_shape=jax.ShapeDtypeStruct((m_pad, n_pad), jnp.float32),
        grid=(m_pad // tm,),
        in_specs=[
            pl.BlockSpec((tm, K), lambda i: (i, 0)),       # patches tile
            pl.BlockSpec((K, n_pad), lambda i: (0, 0)),    # weight (resident)
            pl.BlockSpec((1, n_pad), lambda i: (0, 0)),    # fused BN scale
            pl.BlockSpec((1, n_pad), lambda i: (0, 0)),    # fused BN bias
        ],
        out_specs=pl.BlockSpec((tm, n_pad), lambda i: (i, 0)),
        compiler_params=pltpu.CompilerParams(
            dimension_semantics=("parallel",)),            # megacore on v7x
    )(xb, wb, s2, b2)
    return out[:M, :N]


def matmul_affine_ref(x, w, scale, bias, relu):
    """Pure-JAX reference of the same math (same bf16 operand rounding)."""
    y = jnp.dot(x.astype(jnp.bfloat16), w.astype(jnp.bfloat16),
                preferred_element_type=jnp.float32)
    y = y * scale[None, :].astype(jnp.float32) + bias[None, :].astype(jnp.float32)
    return jnp.maximum(y, 0.0) if relu else y


# ----------------------------------------------------------------------------
# Pallas kernel 2: fused layer3 (conv-as-matmul + BN + ReLU) + Linear
# ----------------------------------------------------------------------------
def _tail_kernel(x_ref, w3_ref, s3_ref, b3_ref, wfc_ref, bfc_ref, o_ref):
    h = jnp.dot(x_ref[...], w3_ref[...], preferred_element_type=jnp.float32)
    h = jnp.maximum(h * s3_ref[...] + b3_ref[...], 0.0)        # layer3 BN+ReLU
    out = jnp.dot(h.astype(jnp.bfloat16), wfc_ref[...],
                  preferred_element_type=jnp.float32) + bfc_ref[...]
    o_ref[...] = out.astype(o_ref.dtype)


def tail_layer3_fc_pallas(x, w3, s3, b3, wfc, bfc):
    """x: [M, K3], w3: [K3, C3], wfc: [C3, NC] -> [M, NC] f32 (single call)."""
    M, K3 = x.shape
    _, C3 = w3.shape
    _, NC = wfc.shape
    m_pad = _round_up(M, 8)
    c_pad = _round_up(max(C3, 128), 128)
    nc_pad = _round_up(max(NC, 128), 128)

    xb = jnp.pad(x.astype(jnp.bfloat16), ((0, m_pad - M), (0, 0)))
    w3b = jnp.pad(w3.astype(jnp.bfloat16), ((0, 0), (0, c_pad - C3)))
    s3p = jnp.pad(s3.astype(jnp.float32), (0, c_pad - C3),
                  constant_values=1.0).reshape(1, c_pad)
    b3p = jnp.pad(b3.astype(jnp.float32), (0, c_pad - C3)).reshape(1, c_pad)
    wfcb = jnp.pad(wfc.astype(jnp.bfloat16),
                   ((0, c_pad - C3), (0, nc_pad - NC)))
    bfcp = jnp.pad(bfc.astype(jnp.float32), (0, nc_pad - NC)).reshape(1, nc_pad)

    out = pl.pallas_call(
        _tail_kernel,
        out_shape=jax.ShapeDtypeStruct((m_pad, nc_pad), jnp.float32),
        grid=(1,),
        in_specs=[
            pl.BlockSpec((m_pad, K3), lambda i: (0, 0)),
            pl.BlockSpec((K3, c_pad), lambda i: (0, 0)),
            pl.BlockSpec((1, c_pad), lambda i: (0, 0)),
            pl.BlockSpec((1, c_pad), lambda i: (0, 0)),
            pl.BlockSpec((c_pad, nc_pad), lambda i: (0, 0)),
            pl.BlockSpec((1, nc_pad), lambda i: (0, 0)),
        ],
        out_specs=pl.BlockSpec((m_pad, nc_pad), lambda i: (0, 0)),
    )(xb, w3b, s3p, b3p, wfcb, bfcp)
    return out[:M, :NC]


def tail_layer3_fc_ref(x, w3, s3, b3, wfc, bfc):
    h = jnp.dot(x.astype(jnp.bfloat16), w3.astype(jnp.bfloat16),
                preferred_element_type=jnp.float32)
    h = jnp.maximum(h * s3[None, :] + b3[None, :], 0.0)
    return jnp.dot(h.astype(jnp.bfloat16), wfc.astype(jnp.bfloat16),
                   preferred_element_type=jnp.float32) + bfc[None, :]


# ----------------------------------------------------------------------------
# Glue: im2col for Conv3d with padding (0, p, p) / stride 1, and MaxPool3d.
# ----------------------------------------------------------------------------
def im2col_3d(x, kd, kh, kw, pad_hw):
    """x: (N, C, D, H, W) -> (M, K) with K ordered as (c_in, kd, kh, kw)."""
    N, C, D, H, W = x.shape
    xp = jnp.pad(x, ((0, 0), (0, 0), (0, 0), (pad_hw, pad_hw), (pad_hw, pad_hw)))
    Do = D - kd + 1
    Ho = H + 2 * pad_hw - kh + 1
    Wo = W + 2 * pad_hw - kw + 1
    slabs = []
    for id_ in range(kd):
        for ih in range(kh):
            for iw in range(kw):
                slabs.append(xp[:, :, id_:id_ + Do, ih:ih + Ho, iw:iw + Wo])
    p = jnp.stack(slabs, axis=0)                 # (kd*kh*kw, N, C, Do, Ho, Wo)
    p = p.transpose(1, 3, 4, 5, 2, 0)            # (N, Do, Ho, Wo, C, kd*kh*kw)
    return p.reshape(N * Do * Ho * Wo, C * kd * kh * kw), (N, Do, Ho, Wo)


def maxpool3d_1x2x2(x):
    """MaxPool3d(kernel=(1,2,2), stride=(1,2,2)), floor mode (PyTorch default)."""
    N, C, D, H, W = x.shape
    Ho, Wo = H // 2, W // 2
    xc = x[:, :, :, : Ho * 2, : Wo * 2].reshape(N, C, D, Ho, 2, Wo, 2)
    return xc.max(axis=(4, 6))


def conv3d_bn_relu(x, weight, conv_bias, gamma, beta, mean, var, pad_hw, matmul_fn,
                   eps=1e-5):
    """Conv3d(stride 1, padding (0,pad,pad)) + BatchNorm3d(eval) + ReLU."""
    Cout, Cin, kd, kh, kw = weight.shape
    # bf16 before im2col: halves the materialized patch matrix and its DMA.
    patches, (N, Do, Ho, Wo) = im2col_3d(x.astype(jnp.bfloat16), kd, kh, kw, pad_hw)
    w2 = weight.reshape(Cout, Cin * kd * kh * kw).T           # (K, Cout)
    bn_scale = gamma / jnp.sqrt(var + eps)
    scale = bn_scale                                          # applied to X@W
    bias = (conv_bias - mean) * bn_scale + beta               # fused conv+BN bias
    y = matmul_fn(patches, w2, scale, bias, True)             # (M, Cout) f32
    return y.reshape(N, Do, Ho, Wo, Cout).transpose(0, 4, 1, 2, 3)


# ----------------------------------------------------------------------------
# Full forward pass
# ----------------------------------------------------------------------------
def cnn3d_new_forward(params, x, use_pallas=True):
    matmul_fn = matmul_affine_pallas if use_pallas else matmul_affine_ref
    tail_fn = tail_layer3_fc_pallas if use_pallas else tail_layer3_fc_ref
    eps = 1e-5

    # torch.unsqueeze(x, dim=1): (N, C_spec, 5, 5) -> (N, 1, D=C_spec, 5, 5)
    x = x[:, None, :, :, :]

    # layer1: Conv3d(1->32, (32,3,3), pad (0,1,1)) + BN + ReLU + MaxPool(1,2,2)
    l1 = conv3d_bn_relu(x, params["w1"], params["b1"], params["g1"], params["be1"],
                        params["m1"], params["v1"], pad_hw=1, matmul_fn=matmul_fn)
    l1 = maxpool3d_1x2x2(l1)

    # layer2: Conv3d(32->64, (32,3,3), pad (0,1,1)) + BN + ReLU + MaxPool + Dropout
    l2 = conv3d_bn_relu(l1, params["w2"], params["b2"], params["g2"], params["be2"],
                        params["m2"], params["v2"], pad_hw=1, matmul_fn=matmul_fn)
    l2 = maxpool3d_1x2x2(l2)
    # Dropout3d(p=0.5): identity in eval mode

    # layer3 (Conv3d(64->128, (D2,1,1)) + BN + ReLU + Dropout) fused with Linear
    Cout3, Cin3, k3, _, _ = params["w3"].shape
    patches3, (N, Do3, Ho3, Wo3) = im2col_3d(l2.astype(jnp.bfloat16), k3, 1, 1, 0)
    assert Do3 == 1 and Ho3 == 1 and Wo3 == 1      # 5x5 patch -> 1x1 after 2 pools
    w3 = params["w3"].reshape(Cout3, Cin3 * k3).T                  # (K3, 128)
    bn_scale3 = params["g3"] / jnp.sqrt(params["v3"] + eps)
    bias3 = (params["b3"] - params["m3"]) * bn_scale3 + params["be3"]
    wfc = params["w_fc"].T                                         # (128, classes)
    out = tail_fn(patches3, w3, bn_scale3, bias3, wfc, params["b_fc"])
    return out


# ----------------------------------------------------------------------------
# Deterministic parameter construction
# ----------------------------------------------------------------------------
def make_params(key, spectral, num_classes):
    d1 = spectral - 31          # depth after layer1 conv
    d2 = d1 - 31                # depth after layer2 conv
    k3 = d2                     # get_CNN3D_new_layer3_channel(dataset)
    ks = jax.random.split(key, 16)

    def nrm(k, shape, s=0.02):
        return jax.random.normal(k, shape, jnp.float32) * s

    def bn(k, c):
        k1, k2, k3_, k4 = jax.random.split(k, 4)
        gamma = jax.random.uniform(k1, (c,), jnp.float32, 0.5, 1.5)
        beta = nrm(k2, (c,), 0.1)
        mean = nrm(k3_, (c,), 0.1)
        var = jax.random.uniform(k4, (c,), jnp.float32, 0.5, 1.5)
        return gamma, beta, mean, var

    p = {}
    p["w1"], p["b1"] = nrm(ks[0], (32, 1, 32, 3, 3)), nrm(ks[1], (32,), 0.05)
    p["g1"], p["be1"], p["m1"], p["v1"] = bn(ks[2], 32)
    p["w2"], p["b2"] = nrm(ks[3], (64, 32, 32, 3, 3)), nrm(ks[4], (64,), 0.05)
    p["g2"], p["be2"], p["m2"], p["v2"] = bn(ks[5], 64)
    p["w3"], p["b3"] = nrm(ks[6], (128, 64, k3, 1, 1)), nrm(ks[7], (128,), 0.05)
    p["g3"], p["be3"], p["m3"], p["v3"] = bn(ks[8], 128)
    p["w_fc"], p["b_fc"] = nrm(ks[9], (num_classes, 128)), nrm(ks[10], (num_classes,), 0.05)
    return p


if __name__ == "__main__":
    # Small synthetic config: spectral channels = 64 (so layer3 kernel depth = 2,
    # fc_in = 128), 9 classes, batch = 2, 5x5 spatial patch (as in the paper).
    N, SPECTRAL, HP, WP, NUM_CLASSES = 2, 64, 5, 5, 9

    key = jax.random.PRNGKey(0)
    kx, kp = jax.random.split(key)
    x = jax.random.normal(kx, (N, SPECTRAL, HP, WP), jnp.float32)
    params = make_params(kp, SPECTRAL, NUM_CLASSES)

    out = cnn3d_new_forward(params, x, use_pallas=True)
    out = jax.block_until_ready(out)
    assert out.shape == (N, NUM_CLASSES), out.shape

    # Sanity check Pallas kernels against a pure-JAX reference of the same
    # (bf16-operand, f32-accumulate) math.
    ref = jax.block_until_ready(cnn3d_new_forward(params, x, use_pallas=False))
    assert jnp.allclose(out, ref, atol=1e-2, rtol=1e-2), (out, ref)
    assert bool(jnp.all(jnp.isfinite(out)))

    print("KERNEL_OK")
</pallas_src>

<mosaic_0001>
module attributes {stable_mosaic.version = 11 : i64} {
  func.func @_matmul_affine_kernel(%arg0: i32, %arg1: memref<512x288xbf16, #tpu.memory_space<vmem>>, %arg2: memref<288x128xbf16, #tpu.memory_space<vmem>>, %arg3: memref<1x128xf32, #tpu.memory_space<vmem>>, %arg4: memref<1x128xf32, #tpu.memory_space<vmem>>, %arg5: memref<512x128xf32, #tpu.memory_space<vmem>>) attributes {dimension_semantics = [#tpu.dimension_semantics<parallel>], iteration_bounds = array<i64: 4>, scalar_prefetch = 0 : i64, scratch_operands = 0 : i64, tpu.core_type = #tpu.core_type<tc>, window_params = [{transform_indices = @transform_0, window_bounds = array<i64: 512, 288>}, {pipeline_mode = #tpu.pipeline_mode<synchronous>, transform_indices = @transform_1, window_bounds = array<i64: 288, 128>}, {pipeline_mode = #tpu.pipeline_mode<synchronous>, transform_indices = @transform_2, window_bounds = array<i64: 1, 128>}, {pipeline_mode = #tpu.pipeline_mode<synchronous>, transform_indices = @transform_3, window_bounds = array<i64: 1, 128>}, {transform_indices = @transform_4, window_bounds = array<i64: 512, 128>}]} {
    %c0 = arith.constant 0 : index
    %c0_0 = arith.constant 0 : index
    %0 = vector.load %arg1[%c0, %c0_0] : memref<512x288xbf16, #tpu.memory_space<vmem>>, vector<512x288xbf16>
    %c0_1 = arith.constant 0 : index
    %c0_2 = arith.constant 0 : index
    %1 = vector.load %arg2[%c0_1, %c0_2] : memref<288x128xbf16, #tpu.memory_space<vmem>>, vector<288x128xbf16>
    %cst = arith.constant dense<0.000000e+00> : vector<512x128xf32>
    %2 = tpu.matmul %0, %1, %cst {dimension_numbers = #tpu.dot_dimension_numbers<[1], [0], [0], [1], [0, 0, 1, 1], [], []>} : vector<512x288xbf16>, vector<288x128xbf16>, vector<512x128xf32> -> vector<512x128xf32>
    %c0_3 = arith.constant 0 : index
    %c0_4 = arith.constant 0 : index
    %3 = vector.load %arg3[%c0_3, %c0_4] : memref<1x128xf32, #tpu.memory_space<vmem>>, vector<1x128xf32>
    %4 = vector.broadcast %3 : vector<1x128xf32> to vector<512x128xf32>
    %5 = arith.mulf %2, %4 : vector<512x128xf32>
    %c0_5 = arith.constant 0 : index
    %c0_6 = arith.constant 0 : index
    %6 = vector.load %arg4[%c0_5, %c0_6] : memref<1x128xf32, #tpu.memory_space<vmem>>, vector<1x128xf32>
    %7 = vector.broadcast %6 : vector<1x128xf32> to vector<512x128xf32>
    %8 = arith.addf %5, %7 : vector<512x128xf32>
    %cst_7 = arith.constant 0.000000e+00 : f32
    %9 = vector.broadcast %cst_7 : f32 to vector<512x128xf32>
    %10 = arith.maximumf %8, %9 : vector<512x128xf32>
    %c0_8 = arith.constant 0 : index
    %c0_9 = arith.constant 0 : index
    %11 = vector.load %arg5[%c0_8, %c0_9] : memref<512x128xf32, #tpu.memory_space<vmem>>, vector<512x128xf32>
    tpu.vector_store %arg5[%c0_8, %c0_9], %10 {strides = array<i32>} : memref<512x128xf32, #tpu.memory_space<vmem>>, vector<512x128xf32>,
    return
  }
  func.func @transform_0(%arg0: i32) -> (i32, i32) {
    %c0_i32 = arith.constant 0 : i32
    %c0_i32_0 = arith.constant 0 : i32
    return %arg0, %c0_i32 : i32, i32
  }
  func.func @transform_1(%arg0: i32) -> (i32, i32) {
    %c0_i32 = arith.constant 0 : i32
    %c0_i32_0 = arith.constant 0 : i32
    %c0_i32_1 = arith.constant 0 : i32
    return %c0_i32, %c0_i32_0 : i32, i32
  }
  func.func @transform_2(%arg0: i32) -> (i32, i32) {
    %c0_i32 = arith.constant 0 : i32
    %c0_i32_0 = arith.constant 0 : i32
    %c0_i32_1 = arith.constant 0 : i32
    return %c0_i32, %c0_i32_0 : i32, i32
  }
  func.func @transform_3(%arg0: i32) -> (i32, i32) {
    %c0_i32 = arith.constant 0 : i32
    %c0_i32_0 = arith.constant 0 : i32
    %c0_i32_1 = arith.constant 0 : i32
    return %c0_i32, %c0_i32_0 : i32, i32
  }
  func.func @transform_4(%arg0: i32) -> (i32, i32) {
    %c0_i32 = arith.constant 0 : i32
    %c0_i32_0 = arith.constant 0 : i32
    return %arg0, %c0_i32 : i32, i32
  }
}

</mosaic_0001>

<bundles_post_ra>
// kernel: tpu_custom_call.1
= control target key start
LH: loop header
LB: loop body
LE: loop exit
PB: predicated region body
PF: predicated region fallthrough
CT: control target
= control target key end

     0   :  { %9 = vsyncpa [#allocation3], 0  ;;  %s3362_s0 = inlined_call_operand.vmem [shape: bf16[2048,288], index: 0, kind: input, shape index: {}]   ;;  %s3363_s1 = inlined_call_operand.vmem [shape: bf16[288,128], index: 1, kind: input, shape index: {}]   ;;  %s3364_s2 = inlined_call_operand.vmem [shape: f32[1,128], index: 2, kind: input, shape index: {}]   ;;  %s3365_s3 = inlined_call_operand.vmem [shape: f32[1,128], index: 3, kind: input, shape index: {}]   ;;  %s3366_s4 = inlined_call_operand.hbm [shape: f32[2048,128], index: 4, kind: output, shape index: {}]  }
   0x1   :  { %11 = vsyncpa [#allocation3 + $0x1], 0  ;;  %s2671_s15 = smov 0   ;;  %s2673_s16 = smov 0  }
   0x2   :  { %s2675_s17 = smov 0   ;;  %s2677_s18 = smov 0  }
   0x3 LB: > { %s2692_s19 = sadd.s32 4294967295, %s2642_s18   ;;  %s1901_s20 = sadd.s32 4294967294, %s2642_s18   ;;  %s2642_s18 = sphi %s2677_s18, %s3372_s18   ;;  %s2638_s17 = sphi %s2675_s17, %s3371_s17   ;;  %s2634_s16 = sphi %s2673_s16, %s3370_s16   ;;  %s2630_s15 = sphi %s2671_s15, %s3369_s15  }
   0x4   : > { %s2696_s21 = sadd.s32 1, %s2642_s18   ;;  %s113_s22 = sadd.s32 1, %s2638_s17 }
   0x5   : > { %s110_s23 = ssub.s32 %s2642_s18, %s2696_s21  ;;  %p123_p0 = scmp.ne.s32.totalorder %s2638_s17, %s2634_s16 }
   0x6   : > { %p111_p1 = scmp.eq.s32.totalorder %s110_s23, 0  ;;  %p124_p2 = scmp.eq.s32.totalorder %s2692_s19, 3 }
   0x7   : > { %p129_p3 = scmp.ne.s32.totalorder %s2634_s16, %s2630_s15  ;;  %p130_p4 = scmp.eq.s32.totalorder %s1901_s20, 3 }
   0x8   : > { %s2707_s24 = scalar_select %p111_p1, %s2638_s17, %s113_s22  }
   0x9   : > { %p2709_p5 = por %p124_p2, %p123_p0  ;;  %p2713_p6 = por %p130_p4, %p129_p3 }
   0xa   : > { %p1904_p7 = scmp.ge.s32.totalorder %s2642_s18, 1  ;;  %p167_p8 = scmp.lt.s32.totalorder %s2642_s18, 5 }
   0xc   : > { %p168_p9 = pnand %p1904_p7, %p167_p8 }
   0xd   : > { %s1906_s7 = sshll.u32 (!%p168_p9), %s2692_s19, 6  ;;  %s191_s11 = sand.u32 (!%p168_p9), 1, %s2634_s16  }
   0xe   : > { %171 = sbr.rel (%p168_p9) target bundleno = 581 (0x245), region = 36  ;;  %p195_p10 = scmp.lt.s32.totalorder (!%p168_p9), %s1906_s7, 255 }
  0x13   : > { %v2504_v0 = vld [vmem:[%s3363_s1 + $0x38] sm:$0xff]  ;;  %v2730_v2 = vld [vmem:[%s3363_s1 + $0x88] sm:$0xff]  ;;  %v2503_v3 = vld [vmem:[%s3363_s1 + $0x30] sm:$0xff]  ;;  %s3374_s7 = smov (!%p195_p10, %s1906_s7), 255  ;;  %vm955_vm0 = vcmask 261120  }
  0x14   : > { %v2725_v1 = vld [vmem:[%s3363_s1 + $0x78] sm:$0xff]  ;;  %1052 = vmatpush.bf16.msra.mxu0 %v2504_v0  ;;  %2516 = vmatpush.bf16.msra.mxu3 %v2504_v0  ;;  %v2511_v4 = vld [vmem:[%s3363_s1 + $0x70] sm:$0xff]  ;;  %v2744_v5 = vld [vmem:[%s3363_s1 + $0x80] sm:$0xff]  ;;  %s2534_s14 = smul.u32 12, %s3374_s7 }
  0x15   : > { %1221 = vmatpush.bf16.msra.mxu1 %v2725_v1  ;;  %1396 = vmatpush.bf16.msra.mxu2 %v2730_v2  ;;  %v2502_v6 = vld [vmem:[%s3363_s1 + $0x28] sm:$0xff]  ;;  %v2501_v11 = vld [vmem:[%s3363_s1 + $0x20] sm:$0xff]  ;;  %v2500_v13 = vld [vmem:[%s3363_s1 + $0x18] sm:$0xff] }
  0x16   : > { %v2510_v7 = vld [vmem:[%s3363_s1 + $0x68] sm:$0xff]  ;;  %s2756_s30 = scalar_lea.vmem %s3362_s0, %s2534_s14  ;;  %v2509_v12 = vld [vmem:[%s3363_s1 + $0x60] sm:$0xff]  ;;  %v2508_v14 = vld [vmem:[%s3363_s1 + $0x58] sm:$0xff]  ;;  %s1905_s14 = sshll.u32 %s191_s11, 9 }
  0x17   : > { %v1918_v8 = vld [vmem:[%s2756_s30 + $0x8] sm:$0xf]  ;;  %v2403_v9 = vld [vmem:[%s2756_s30 + $0x10] sm:$0xf0]  ;;  %v1930_v17 = vld [vmem:[%s2756_s30 + $0x20] sm:$0xf] }
  0x18   : > { %1053 = vmatpush.bf16.msra.mxu0 %v2503_v3  ;;  %2517 = vmatpush.bf16.msra.mxu3 %v2503_v3  ;;  %v1919_v10 = vor.u32 %v2403_v9, %v1918_v8  ;;  %v2499_v15 = vld [vmem:[%s3363_s1 + $0x10] sm:$0xff]  ;;  %v2406_v18 = vld [vmem:[%s2756_s30 + $0x28] sm:$0xf0]  ;;  %v2497_v22 = vld [vmem:[%s3363_s1] sm:$0xff]  ;;  %s2895_s20 = scalar_lea.vmem [#allocation2], %s1905_s14  ;;  %s2600_s14 = scalar_lea.hbm %s3366_s4, 2048 }
  0x19   : > { %1222 = vmatpush.bf16.msra.mxu1 %v2511_v4  ;;  %1397 = vmatpush.bf16.msra.mxu2 %v2744_v5  ;;  %v2507_v16 = vld [vmem:[%s3363_s1 + $0x50] sm:$0xff]  ;;  %v2498_v19 = vld [vmem:[%s3363_s1 + $0x8] sm:$0xff]  ;;  %v1931_v21 = vor.u32 %v2406_v18, %v1930_v17  ;;  %v1910_v23 = vld [vmem:[%s2756_s30] sm:$0xf]  ;;  %s1836_s7 = sshll.u32 %s2895_s20, 4  ;;  %s1837_s7 = int_to_ptr.vmem [resolvable:$true] %s1836_s7 }
  0x1a   : > { %v2506_v20 = vld [vmem:[%s3363_s1 + $0x48] sm:$0xff]  ;;  %v2198_v25 = vld [vmem:[%s2756_s30 + $0x240] sm:$0xf]  ;;  %v2401_v28 = vld [vmem:[%s2756_s30 + $0x4] sm:$0xf] }
  0x1b   : > { %v2402_v24 = vld [vmem:[%s2756_s30 + $0x8] sm:$0xf0]  ;;  %v2505_v27 = vld [vmem:[%s3363_s1 + $0x40] sm:$0xff]  ;;  %v1912_v29 = vld [vmem:[%s2756_s30 + $0xc] sm:$0xf0] }
  0x1c   : > { %1054 = vmatpush.bf16.msra.mxu0 %v2502_v6  ;;  %2518 = vmatpush.bf16.msra.mxu3 %v2502_v6  ;;  %v2474_v26 = vld [vmem:[%s2756_s30 + $0x248] sm:$0xf0]  ;;  %v1911_v30 = vor.u32 %v2402_v24, %v1910_v23  ;;  %v1915_v32 = vor.u32 %v2401_v28, %v1912_v29  ;;  %v1942_v33 = vld [vmem:[%s2756_s30 + $0x38] sm:$0xf]  ;;  %v2409_v34 = vld [vmem:[%s2756_s30 + $0x40] sm:$0xf0] }
  0x1d   : > { %1223 = vmatpush.bf16.msra.mxu1 %v2510_v7  ;;  %2364 = vmatmul.msk.bf16.vlgmr.msra.gmra.mxu2 %vm955_vm0, %v1919_v10  ;;  %v2199_v31 = vor.u32 %v2474_v26, %v2198_v25  ;;  %v1943_v35 = vor.u32 %v2409_v34, %v1942_v33  ;;  %v1922_v36 = vld [vmem:[%s2756_s30 + $0x18] sm:$0xf]  ;;  %v2405_v37 = vld [vmem:[%s2756_s30 + $0x20] sm:$0xf0]  ;;  %v2404_v40 = vld [vmem:[%s2756_s30 + $0x1c] sm:$0xf] }
  0x1e   : > { %v2210_v38 = vld [vmem:[%s2756_s30 + $0x258] sm:$0xf]  ;;  %v2477_v39 = vld [vmem:[%s2756_s30 + $0x260] sm:$0xf0]  ;;  %v1924_v41 = vld [vmem:[%s2756_s30 + $0x24] sm:$0xf0]  ;;  %v1923_v42 = vor.u32 %v2405_v37, %v1922_v36 }
  0x1f   : > { %v2211_v43 = vor.u32 %v2477_v39, %v2210_v38  ;;  %v1927_v44 = vor.u32 %v2404_v40, %v1924_v41  ;;  %v1954_v45 = vld [vmem:[%s2756_s30 + $0x50] sm:$0xf]  ;;  %v2412_v46 = vld [vmem:[%s2756_s30 + $0x58] sm:$0xf0]  ;;  %v2407_v52 = vld [vmem:[%s2756_s30 + $0x34] sm:$0xf] }
  0x20   : > { %1055 = vmatpush.bf16.msra.mxu0 %v2501_v11  ;;  %2519 = vmatpush.bf16.msra.mxu3 %v2501_v11  ;;  %v1955_v47 = vor.u32 %v2412_v46, %v1954_v45  ;;  %v1934_v48 = vld [vmem:[%s2756_s30 + $0x30] sm:$0xf]  ;;  %v2408_v49 = vld [vmem:[%s2756_s30 + $0x38] sm:$0xf0]  ;;  %v1936_v53 = vld [vmem:[%s2756_s30 + $0x3c] sm:$0xf0] }
  0x21   : > { %1224 = vmatpush.bf16.msra.mxu1 %v2509_v12  ;;  %v2222_v50 = vld [vmem:[%s2756_s30 + $0x270] sm:$0xf]  ;;  %v2480_v51 = vld [vmem:[%s2756_s30 + $0x278] sm:$0xf0]  ;;  %v1935_v54 = vor.u32 %v2408_v49, %v1934_v48  ;;  %v1939_v56 = vor.u32 %v2407_v52, %v1936_v53  ;;  %v1966_v57 = vld [vmem:[%s2756_s30 + $0x68] sm:$0xf] }
  0x22   : > { %v2223_v55 = vor.u32 %v2480_v51, %v2222_v50  ;;  %v2415_v58 = vld [vmem:[%s2756_s30 + $0x70] sm:$0xf0]  ;;  %v1946_v60 = vld [vmem:[%s2756_s30 + $0x48] sm:$0xf]  ;;  %v2410_v0 = vld [vmem:[%s2756_s30 + $0x4c] sm:$0xf] }
  0x23   : > { %v1967_v59 = vor.u32 %v2415_v58, %v1966_v57  ;;  %v2411_v61 = vld [vmem:[%s2756_s30 + $0x50] sm:$0xf0]  ;;  %v2234_v62 = vld [vmem:[%s2756_s30 + $0x288] sm:$0xf]  ;;  %v2418_v6 = vld [vmem:[%s2756_s30 + $0x88] sm:$0xf0] }
  0x24   : > { %1056 = vmatpush.bf16.msra.mxu0 %v2500_v13  ;;  %2520 = vmatpush.bf16.msra.mxu3 %v2500_v13  ;;  %v2483_v63 = vld [vmem:[%s2756_s30 + $0x290] sm:$0xf0]  ;;  %v1958_v8 = vld [vmem:[%s2756_s30 + $0x60] sm:$0xf]  ;;  %v2414_v9 = vld [vmem:[%s2756_s30 + $0x68] sm:$0xf0] }
  0x25   : > { %1225 = vmatpush.bf16.msra.mxu1 %v2508_v14  ;;  %v2235_v3 = vor.u32 %v2483_v63, %v2234_v62  ;;  %v2246_v10 = vld [vmem:[%s2756_s30 + $0x2a0] sm:$0xf]  ;;  %v2486_v11 = vld [vmem:[%s2756_s30 + $0x2a8] sm:$0xf0]  ;;  %v1960_v13 = vld [vmem:[%s2756_s30 + $0x6c] sm:$0xf0] }
  0x26   : > { %v1990_v17 = vld [vmem:[%s2756_s30 + $0x98] sm:$0xf]  ;;  %v2421_v18 = vld [vmem:[%s2756_s30 + $0xa0] sm:$0xf0]  ;;  %v2416_v24 = vld [vmem:[%s2756_s30 + $0x7c] sm:$0xf] }
  0x27   : > { %v2489_v23 = vld [vmem:[%s2756_s30 + $0x2c0] sm:$0xf0]  ;;  %v1972_v25 = vld [vmem:[%s2756_s30 + $0x84] sm:$0xf0]  ;;  %v2002_v29 = vld [vmem:[%s2756_s30 + $0xb0] sm:$0xf] }
  0x28   : > { %1057 = vmatpush.bf16.msra.mxu0 %v2499_v15  ;;  %2521 = vmatpush.bf16.msra.mxu3 %v2499_v15  ;;  %v2247_v15 = vor.u32 %v2486_v11, %v2246_v10  ;;  %v1975_v28 = vor.u32 %v2416_v24, %v1972_v25  ;;  %v2420_v33 = vld [vmem:[%s2756_s30 + $0x98] sm:$0xf0]  ;;  %v2270_v34 = vld [vmem:[%s2756_s30 + $0x2d0] sm:$0xf]  ;;  %v2419_v36 = vld [vmem:[%s2756_s30 + $0x94] sm:$0xf] }
  0x29   : > { %1226 = vmatpush.bf16.msra.mxu1 %v2507_v16  ;;  %v1984_v37 = vld [vmem:[%s2756_s30 + $0x9c] sm:$0xf0]  ;;  %v2014_v41 = vld [vmem:[%s2756_s30 + $0xc8] sm:$0xf]  ;;  %v2423_v45 = vld [vmem:[%s2756_s30 + $0xb0] sm:$0xf0] }
  0x2a   : > { %v1987_v40 = vor.u32 %v2419_v36, %v1984_v37  ;;  %v2282_v46 = vld [vmem:[%s2756_s30 + $0x2e8] sm:$0xf]  ;;  %v2422_v48 = vld [vmem:[%s2756_s30 + $0xac] sm:$0xf]  ;;  %v1996_v49 = vld [vmem:[%s2756_s30 + $0xb4] sm:$0xf0] }
  0x2b   : > { %v1999_v53 = vor.u32 %v2422_v48, %v1996_v49  ;;  %v2006_v58 = vld [vmem:[%s2756_s30 + $0xc0] sm:$0xf]  ;;  %v2425_v62 = vld [vmem:[%s2756_s30 + $0xc4] sm:$0xf]  ;;  %v2008_v63 = vld [vmem:[%s2756_s30 + $0xcc] sm:$0xf0] }
  0x2c   : > { %1058 = vmatpush.bf16.msra.mxu0 %v2498_v19  ;;  %2522 = vmatpush.bf16.msra.mxu3 %v2498_v19  ;;  %v1991_v19 = vor.u32 %v2421_v18, %v1990_v17  ;;  %v2476_v24 = vld [vmem:[%s2756_s30 + $0x25c] sm:$0xf]  ;;  %v2212_v25 = vld [vmem:[%s2756_s30 + $0x264] sm:$0xf0] }
  0x2d   : > { %1227 = vmatpush.bf16.msra.mxu1 %v2506_v20  ;;  %2365 = vmatmul.msk.bf16.gmra.mxu2 %vm955_vm0, %v1931_v21  ;;  %v2417_v21 = vld [vmem:[%s2756_s30 + $0x80] sm:$0xf0] }
  0x30   : > { %1059 = vmatpush.bf16.msra.mxu0 %v2497_v22  ;;  %2523 = vmatpush.bf16.msra.mxu3 %v2497_v22  ;;  %v2258_v22 = vld [vmem:[%s2756_s30 + $0x2b8] sm:$0xf] }
  0x31   : > { %1228 = vmatpush.bf16.msra.mxu1 %v2505_v27 }
  0x33   : > { %1060 = vmatmul.bf16.vlgmr.msra.gmra.mxu0 %v1911_v30  ;;  %1180 = vmatmul.bf16.vlgmr.msra.gmra.mxu3 %v2199_v31  ;;  %v2424_v30 = vld [vmem:[%s2756_s30 + $0xb8] sm:$0xf0] }
  0x34   : > { %2524 = vmatpush.bf16.msrb.mxu3 %v2725_v1  ;;  %1229 = vmatmul.bf16.vlgmr.msra.gmra.mxu1 %v1915_v32  ;;  %v1948_v1 = vld [vmem:[%s2756_s30 + $0x54] sm:$0xf0]  ;;  %v2003_v31 = vor.u32 %v2424_v30, %v2002_v29  ;;  %v1982_v32 = vld [vmem:[%s2756_s30 + $0x90] sm:$0xf] }
  0x35   : > { %v1983_v38 = vor.u32 %v2420_v33, %v1982_v32 }
  0x38   : > { %2525 = vmatpush.bf16.msrb.mxu3 %v2511_v4  ;;  %v1951_v4 = vor.u32 %v2410_v0, %v1948_v1 }
  0x3c   : > { %2526 = vmatpush.bf16.msrb.mxu3 %v2510_v7 }
  0x3d   : > { %2366 = vmatmul.msk.bf16.gmra.mxu2 %vm955_vm0, %v1943_v35  ;;  %v2492_v35 = vld [vmem:[%s2756_s30 + $0x2d8] sm:$0xf0] }
  0x3e   : > { %v2271_v39 = vor.u32 %v2492_v35, %v2270_v34 }
  0x40   : > { %2527 = vmatpush.bf16.msrb.mxu3 %v2509_v12  ;;  %v2413_v12 = vld [vmem:[%s2756_s30 + $0x64] sm:$0xf] }
  0x43   : > { %1065 = vmatmul.bf16.gmra.mxu0 %v1923_v42  ;;  %1185 = vmatmul.bf16.gmra.mxu3 %v2211_v43  ;;  %v2427_v42 = vld [vmem:[%s2756_s30 + $0xd0] sm:$0xf0] }
  0x44   : > { %2528 = vmatpush.bf16.msrb.mxu3 %v2508_v14  ;;  %1234 = vmatmul.bf16.gmra.mxu1 %v1927_v44  ;;  %v1959_v14 = vor.u32 %v2414_v9, %v1958_v8  ;;  %v2015_v43 = vor.u32 %v2427_v42, %v2014_v41  ;;  %v1994_v44 = vld [vmem:[%s2756_s30 + $0xa8] sm:$0xf]  ;;  %v2884_v9 = vld [vmem:[%s3365_s3] ss:$0 sm:$0xff]  ;;  %v2050_v42 = vld [vmem:[%s2756_s30 + $0x110] sm:$0xf] }
  0x45   : > { %v1995_v50 = vor.u32 %v2423_v45, %v1994_v44 }
  0x48   : > { %2529 = vmatpush.bf16.msrb.mxu3 %v2507_v16  ;;  %v1963_v16 = vor.u32 %v2413_v12, %v1960_v13  ;;  %v2038_v12 = vld [vmem:[%s2756_s30 + $0xf8] sm:$0xf]  ;;  %v2433_v13 = vld [vmem:[%s2756_s30 + $0x100] sm:$0xf0] }
  0x49   : > { %v2039_v18 = vor.u32 %v2433_v13, %v2038_v12  ;;  %v2439_v12 = vld [vmem:[%s2756_s30 + $0x130] sm:$0xf0] }
  0x4c   : > { %2530 = vmatpush.bf16.msrb.mxu3 %v2506_v20  ;;  %v1970_v20 = vld [vmem:[%s2756_s30 + $0x78] sm:$0xf] }
  0x4d   : > { %2367 = vmatmul.msk.bf16.gmra.mxu2 %vm955_vm0, %v1955_v47  ;;  %v1971_v26 = vor.u32 %v2417_v21, %v1970_v20  ;;  %v2495_v47 = vld [vmem:[%s2756_s30 + $0x2f0] sm:$0xf0]  ;;  %v2018_v21 = vld [vmem:[%s2756_s30 + $0xd8] sm:$0xf] }
  0x4e   : > { %v2283_v51 = vor.u32 %v2495_v47, %v2282_v46 }
  0x50   : > { %2531 = vmatpush.bf16.msrb.mxu3 %v2505_v27  ;;  %v2259_v27 = vor.u32 %v2489_v23, %v2258_v22  ;;  %v2429_v23 = vld [vmem:[%s2756_s30 + $0xe0] sm:$0xf0] }
  0x51   : > { %v2019_v30 = vor.u32 %v2429_v23, %v2018_v21  ;;  %v2435_v21 = vld [vmem:[%s2756_s30 + $0x110] sm:$0xf0]  ;;  %v2482_v23 = vld [vmem:[%s2756_s30 + $0x28c] sm:$0xf] }
  0x53   : > { %1070 = vmatmul.bf16.gmra.mxu0 %v1935_v54  ;;  %1190 = vmatmul.bf16.gmra.mxu3 %v2223_v55  ;;  %v2026_v54 = vld [vmem:[%s2756_s30 + $0xe0] sm:$0xf]  ;;  %v2430_v55 = vld [vmem:[%s2756_s30 + $0xe8] sm:$0xf0] }
  0x54   : > { %2532 = vmatpush.bf16.msra.mxu3 %v2730_v2  ;;  %1239 = vmatmul.bf16.gmra.mxu1 %v1939_v56  ;;  %v1947_v2 = vor.u32 %v2411_v61, %v1946_v60  ;;  %v2027_v57 = vor.u32 %v2430_v55, %v2026_v54  ;;  %v2473_v60 = vld [vmem:[%s2756_s30 + $0x244] sm:$0xf]  ;;  %v2200_v61 = vld [vmem:[%s2756_s30 + $0x24c] sm:$0xf0]  ;;  %v2479_v54 = vld [vmem:[%s2756_s30 + $0x274] sm:$0xf] }
  0x55   : > { %v2203_v1 = vor.u32 %v2473_v60, %v2200_v61  ;;  %v2224_v55 = vld [vmem:[%s2756_s30 + $0x27c] sm:$0xf0] }
  0x56   : > { %v2227_v61 = vor.u32 %v2479_v54, %v2224_v55  ;;  %v2485_v55 = vld [vmem:[%s2756_s30 + $0x2a4] sm:$0xf] }
  0x58   : > { %2533 = vmatpush.bf16.msra.mxu3 %v2744_v5  ;;  %v1978_v5 = vld [vmem:[%s2756_s30 + $0x80] sm:$0xf] }
  0x59   : > { %v1979_v7 = vor.u32 %v2418_v6, %v1978_v5 }
  0x5d   : > { %2368 = vmatmul.msk.bf16.gmra.mxu2 %vm955_vm0, %v1967_v59  ;;  %v2426_v59 = vld [vmem:[%s2756_s30 + $0xc8] sm:$0xf0] }
  0x5e   : > { %v2007_v0 = vor.u32 %v2426_v59, %v2006_v58 }
  0x63   : > { %1075 = vmatmul.bf16.gmra.mxu0 %v1947_v2  ;;  %1195 = vmatmul.bf16.gmra.mxu3 %v2235_v3 }
  0x64   : > { %1244 = vmatmul.bf16.gmra.mxu1 %v1951_v4  ;;  %v2011_v4 = vor.u32 %v2425_v62, %v2008_v63 }
  0x6d   : > { %2369 = vmatmul.msk.bf16.gmra.mxu2 %vm955_vm0, %v1979_v7  ;;  %v2878_v7 = vld [vmem:[%s3364_s2] ss:$0 sm:$0xff] }
  0x73   : > { %1080 = vmatmul.bf16.gmra.mxu0 %v1959_v14  ;;  %1200 = vmatmul.bf16.gmra.mxu3 %v2247_v15 }
  0x74   : > { %1249 = vmatmul.bf16.gmra.mxu1 %v1963_v16 }
  0x7d   : > { %2370 = vmatmul.msk.bf16.gmra.mxu2 %vm955_vm0, %v1991_v19 }
  0x83   : > { %1085 = vmatmul.bf16.gmra.mxu0 %v1971_v26  ;;  %1205 = vmatmul.bf16.gmra.mxu3 %v2259_v27  ;;  %v2428_v26 = vld [vmem:[%s2756_s30 + $0xdc] sm:$0xf]  ;;  %v2020_v27 = vld [vmem:[%s2756_s30 + $0xe4] sm:$0xf0] }
  0x84   : > { %1254 = vmatmul.bf16.gmra.mxu1 %v1975_v28  ;;  %v2023_v35 = vor.u32 %v2428_v26, %v2020_v27  ;;  %v2044_v26 = vld [vmem:[%s2756_s30 + $0x114] sm:$0xf0] }
  0x8d   : > { %2371 = vmatmul.msk.bf16.gmra.mxu2 %vm955_vm0, %v2003_v31  ;;  %v2215_v31 = vor.u32 %v2476_v24, %v2212_v25  ;;  %v2236_v24 = vld [vmem:[%s2756_s30 + $0x294] sm:$0xf0]  ;;  %v2434_v25 = vld [vmem:[%s2756_s30 + $0x10c] sm:$0xf] }
  0x93   : > { %1090 = vmatmul.bf16.gmra.mxu0 %v1983_v38  ;;  %1210 = vmatmul.bf16.gmra.mxu3 %v2271_v39 }
  0x94   : > { %1259 = vmatmul.bf16.gmra.mxu1 %v1987_v40 }
  0x9d   : > { %2372 = vmatmul.msk.bf16.gmra.mxu2 %vm955_vm0, %v2015_v43  ;;  %v2436_v43 = vld [vmem:[%s2756_s30 + $0x118] sm:$0xf0] }
  0x9e   : > { %v2051_v48 = vor.u32 %v2436_v43, %v2050_v42  ;;  %v2074_v43 = vld [vmem:[%s2756_s30 + $0x140] sm:$0xf] }
  0xa0   : > { %v1399_v52 = vpop.f32.mrf.mxu2 }
  0xa3   : > { %1095 = vmatmul.bf16.gmra.mxu0 %v1995_v50  ;;  %1215 = vmatmul.bf16.gmra.mxu3 %v2283_v51  ;;  %v2030_v51 = vld [vmem:[%s2756_s30 + $0xf0] sm:$0xf] }
  0xa4   : > { %1264 = vmatmul.bf16.gmra.mxu1 %v1999_v53 }
  0xa8   : > { %v1401_v56 = vpop.f32.mrf.mxu2 }
  0xad   : > { %2373 = vmatmul.msk.bf16.gmra.mxu2 %vm955_vm0, %v2027_v57  ;;  %v2032_v57 = vld [vmem:[%s2756_s30 + $0xfc] sm:$0xf0] }
  0xb0   : > { %v1404_v2 = vpop.f32.mrf.mxu2  ;;  %v1061_v3 = vpop.f32.mrf.mxu0 }
  0xb1   : > { %v1230_v5 = vpop.f32.mrf.mxu1 }
  0xb2   : > { %v1231_v6 = vadd.f32 %v1230_v5, %v1061_v3 }
  0xb3   : > { %1100 = vmatmul.bf16.gmra.mxu0 %v2007_v0  ;;  %1349 = vmatmul.bf16.vlgmr.msrb.gmra.mxu3 %v2203_v1 }
  0xb4   : > { %v1400_v8 = vadd.f32 %v1399_v52, %v1231_v6  ;;  %1269 = vmatmul.bf16.gmra.mxu1 %v2011_v4  ;;  %v2432_v52 = vld [vmem:[%s2756_s30 + $0xf8] sm:$0xf0] }
  0xb5   : > { %v2031_v60 = vor.u32 %v2432_v52, %v2030_v51  ;;  %v2054_v52 = vld [vmem:[%s2756_s30 + $0x120] sm:$0xf] }
  0xb6   : > { %v1563_v10 = vmul.f32 %v2878_v7, %v1400_v8  ;;  %v2889_v11 = vpop.f32.mrf.mxu3 }
  0xb8   : > { %v1631_v14 = vadd.f32 %v2884_v9, %v1563_v10  ;;  %v1406_v15 = vpop.f32.mrf.mxu2  ;;  %v1063_v16 = vpop.f32.mrf.mxu0  ;;  %v2062_v10 = vld [vmem:[%s2756_s30 + $0x128] sm:$0xf] }
  0xb9   : > { %v1232_v17 = vpop.f32.mrf.mxu1 }
  0xba   : > { %v1695_v19 = vmax.f32 %v1631_v14, 0.0  ;;  %v1233_v20 = vadd.f32 %v1232_v17, %v1063_v16  ;;  %v2063_v17 = vor.u32 %v2439_v12, %v2062_v10 }
  0xbc   : > { %1759 = vst [vmem:[%s2895_s20] sm:$0xff] %v1695_v19  ;;  %v1402_v22 = vadd.f32 %v1401_v56, %v1233_v20  ;;  %v2431_v56 = vld [vmem:[%s2756_s30 + $0xf4] sm:$0xf]  ;;  %v2042_v20 = vld [vmem:[%s2756_s30 + $0x108] sm:$0xf] }
  0xbd   : > { %2374 = vmatmul.msk.bf16.gmra.mxu2 %vm955_vm0, %v2039_v18  ;;  %v2035_v1 = vor.u32 %v2431_v56, %v2032_v57  ;;  %v2248_v56 = vld [vmem:[%s2756_s30 + $0x2ac] sm:$0xf0]  ;;  %v2437_v57 = vld [vmem:[%s2756_s30 + $0x124] sm:$0xf] }
  0xbe   : > { %v1564_v28 = vmul.f32 %v2878_v7, %v1402_v22  ;;  %v2905_v29 = vpop.f32.mrf.mxu3 }
  0xc0   : > { %v1632_v32 = vadd.f32 %v2884_v9, %v1564_v28  ;;  %v1409_v33 = vpop.f32.mrf.mxu2  ;;  %v1066_v34 = vpop.f32.mrf.mxu0 }
  0xc1   : > { %v1235_v36 = vpop.f32.mrf.mxu1 }
  0xc2   : > { %v1696_v37 = vmax.f32 %v1632_v32, 0.0  ;;  %v1236_v38 = vadd.f32 %v1235_v36, %v1066_v34 }
  0xc3   : > { %1105 = vmatmul.bf16.gmra.mxu0 %v2019_v30  ;;  %1354 = vmatmul.bf16.gmra.mxu3 %v2215_v31  ;;  %v2043_v30 = vor.u32 %v2435_v21, %v2042_v20  ;;  %v2239_v31 = vor.u32 %v2482_v23, %v2236_v24  ;;  %v2066_v23 = vld [vmem:[%s2756_s30 + $0x138] sm:$0xf]  ;;  %v2441_v24 = vld [vmem:[%s2756_s30 + $0x140] sm:$0xf0] }
  0xc4   : > { %1760 = vst [vmem:[%s2895_s20 + $0x8] sm:$0xff] %v1696_v37  ;;  %v1405_v39 = vadd.f32 %v1404_v2, %v1236_v38  ;;  %1274 = vmatmul.bf16.gmra.mxu1 %v2023_v35  ;;  %v2047_v35 = vor.u32 %v2434_v25, %v2044_v26  ;;  %v2488_v26 = vld [vmem:[%s2756_s30 + $0x2bc] sm:$0xf] }
  0xc6   : > { %v1565_v40 = vmul.f32 %v2878_v7, %v1405_v39  ;;  %v2910_v41 = vpop.f32.mrf.mxu3 }
  0xc8   : > { %v1633_v44 = vadd.f32 %v2884_v9, %v1565_v40  ;;  %v1411_v45 = vpop.f32.mrf.mxu2  ;;  %v1068_v46 = vpop.f32.mrf.mxu0 }
  0xc9   : > { %v1237_v47 = vpop.f32.mrf.mxu1 }
  0xca   : > { %v1697_v49 = vmax.f32 %v1633_v44, 0.0  ;;  %v1238_v50 = vadd.f32 %v1237_v47, %v1068_v46  ;;  %v2442_v44 = vld [vmem:[%s2756_s30 + $0x148] sm:$0xf0] }
  0xcc   : > { %1761 = vst [vmem:[%s2895_s20 + $0x10] sm:$0xff] %v1697_v49  ;;  %v1407_v53 = vadd.f32 %v1406_v15, %v1238_v50  ;;  %v2075_v49 = vor.u32 %v2442_v44, %v2074_v43 }
  0xcd   : > { %2375 = vmatmul.msk.bf16.gmra.mxu2 %vm955_vm0, %v2051_v48 }
  0xce   : > { %v1566_v58 = vmul.f32 %v2878_v7, %v1407_v53  ;;  %v2924_v59 = vpop.f32.mrf.mxu3  ;;  %v2438_v53 = vld [vmem:[%s2756_s30 + $0x128] sm:$0xf0] }
  0xd0   : > { %v1634_v62 = vadd.f32 %v2884_v9, %v1566_v58  ;;  %v1414_v63 = vpop.f32.mrf.mxu2  ;;  %v1071_v0 = vpop.f32.mrf.mxu0  ;;  %v2056_v58 = vld [vmem:[%s2756_s30 + $0x12c] sm:$0xf0] }
  0xd1   : > { %v1240_v2 = vpop.f32.mrf.mxu1 }
  0xd2   : > { %v1698_v3 = vmax.f32 %v1634_v62, 0.0  ;;  %v1241_v4 = vadd.f32 %v1240_v2, %v1071_v0  ;;  %v2055_v62 = vor.u32 %v2438_v53, %v2054_v52 }
  0xd3   : > { %1110 = vmatmul.bf16.gmra.mxu0 %v2031_v60  ;;  %1359 = vmatmul.bf16.gmra.mxu3 %v2227_v61 }
  0xd4   : > { %1762 = vst [vmem:[%s2895_s20 + $0x18] sm:$0xff] %v1698_v3  ;;  %v1410_v5 = vadd.f32 %v1409_v33, %v1241_v4  ;;  %1279 = vmatmul.bf16.gmra.mxu1 %v2035_v1  ;;  %v2059_v3 = vor.u32 %v2437_v57, %v2056_v58  ;;  %v2078_v57 = vld [vmem:[%s2756_s30 + $0x150] sm:$0xf]  ;;  %v2444_v58 = vld [vmem:[%s2756_s30 + $0x158] sm:$0xf0] }
  0xd6   : > { %v1567_v6 = vmul.f32 %v2878_v7, %v1410_v5  ;;  %v2929_v8 = vpop.f32.mrf.mxu3 }
  0xd8   : > { %v1635_v13 = vadd.f32 %v2884_v9, %v1567_v6  ;;  %v1416_v14 = vpop.f32.mrf.mxu2  ;;  %v1073_v15 = vpop.f32.mrf.mxu0 }
  0xd9   : > { %v1242_v16 = vpop.f32.mrf.mxu1 }
  0xda   : > { %v1699_v18 = vmax.f32 %v1635_v13, 0.0  ;;  %v1243_v19 = vadd.f32 %v1242_v16, %v1073_v15  ;;  %v2445_v15 = vld [vmem:[%s2756_s30 + $0x160] sm:$0xf0] }
  0xdc   : > { %1763 = vst [vmem:[%s2895_s20 + $0x20] sm:$0xff] %v1699_v18  ;;  %v1412_v22 = vadd.f32 %v1411_v45, %v1243_v19 }
  0xdd   : > { %2376 = vmatmul.msk.bf16.gmra.mxu2 %vm955_vm0, %v2063_v17 }
  0xde   : > { %v1568_v27 = vmul.f32 %v2878_v7, %v1412_v22  ;;  %v2943_v28 = vpop.f32.mrf.mxu3 }
  0xe0   : > { %v1636_v32 = vadd.f32 %v2884_v9, %v1568_v27  ;;  %v1419_v33 = vpop.f32.mrf.mxu2  ;;  %v1076_v34 = vpop.f32.mrf.mxu0  ;;  %v2260_v27 = vld [vmem:[%s2756_s30 + $0x2c4] sm:$0xf0] }
  0xe1   : > { %v1245_v36 = vpop.f32.mrf.mxu1 }
  0xe2   : > { %v1700_v37 = vmax.f32 %v1636_v32, 0.0  ;;  %v1246_v38 = vadd.f32 %v1245_v36, %v1076_v34  ;;  %v2067_v34 = vor.u32 %v2441_v24, %v2066_v23 }
  0xe3   : > { %1115 = vmatmul.bf16.gmra.mxu0 %v2043_v30  ;;  %1364 = vmatmul.bf16.gmra.mxu3 %v2239_v31  ;;  %v2440_v30 = vld [vmem:[%s2756_s30 + $0x13c] sm:$0xf]  ;;  %v2068_v31 = vld [vmem:[%s2756_s30 + $0x144] sm:$0xf0] }
  0xe4   : > { %1764 = vst [vmem:[%s2895_s20 + $0x28] sm:$0xff] %v1700_v37  ;;  %v1415_v39 = vadd.f32 %v1414_v63, %v1246_v38  ;;  %1284 = vmatmul.bf16.gmra.mxu1 %v2047_v35  ;;  %v2251_v63 = vor.u32 %v2485_v55, %v2248_v56  ;;  %v2263_v35 = vor.u32 %v2488_v26, %v2260_v27 }
  0xe6   : > { %v1569_v40 = vmul.f32 %v2878_v7, %v1415_v39  ;;  %v2948_v42 = vpop.f32.mrf.mxu3  ;;  %v2071_v39 = vor.u32 %v2440_v30, %v2068_v31 }
  0xe8   : > { %v1637_v45 = vadd.f32 %v2884_v9, %v1569_v40  ;;  %v1421_v46 = vpop.f32.mrf.mxu2  ;;  %v1078_v47 = vpop.f32.mrf.mxu0 }
  0xe9   : > { %v1247_v48 = vpop.f32.mrf.mxu1 }
  0xea   : > { %v1701_v50 = vmax.f32 %v1637_v45, 0.0  ;;  %v1248_v51 = vadd.f32 %v1247_v48, %v1078_v47  ;;  %v2098_v48 = vld [vmem:[%s2756_s30 + $0x170] sm:$0xf] }
  0xec   : > { %1765 = vst [vmem:[%s2895_s20 + $0x30] sm:$0xff] %v1701_v50  ;;  %v1417_v54 = vadd.f32 %v1416_v14, %v1248_v51  ;;  %v2086_v14 = vld [vmem:[%s2756_s30 + $0x158] sm:$0xf] }
  0xed   : > { %2377 = vmatmul.msk.bf16.gmra.mxu2 %vm955_vm0, %v2075_v49  ;;  %v2087_v20 = vor.u32 %v2445_v15, %v2086_v14  ;;  %v2448_v49 = vld [vmem:[%s2756_s30 + $0x178] sm:$0xf0] }
  0xee   : > { %v1570_v60 = vmul.f32 %v2878_v7, %v1417_v54  ;;  %v2962_v61 = vpop.f32.mrf.mxu3  ;;  %v2099_v54 = vor.u32 %v2448_v49, %v2098_v48 }
  0xf0   : > { %v1638_v0 = vadd.f32 %v2884_v9, %v1570_v60  ;;  %v1424_v1 = vpop.f32.mrf.mxu2  ;;  %v1081_v2 = vpop.f32.mrf.mxu0 }
  0xf1   : > { %v1250_v4 = vpop.f32.mrf.mxu1 }
  0xf2   : > { %v1702_v5 = vmax.f32 %v1638_v0, 0.0  ;;  %v1251_v6 = vadd.f32 %v1250_v4, %v1081_v2  ;;  %v2443_v0 = vld [vmem:[%s2756_s30 + $0x154] sm:$0xf]  ;;  %v2079_v4 = vor.u32 %v2444_v58, %v2078_v57  ;;  %v2122_v57 = vld [vmem:[%s2756_s30 + $0x1a0] sm:$0xf] }
  0xf3   : > { %1120 = vmatmul.bf16.gmra.mxu0 %v2055_v62  ;;  %1369 = vmatmul.bf16.gmra.mxu3 %v2251_v63  ;;  %v2491_v62 = vld [vmem:[%s2756_s30 + $0x2d4] sm:$0xf]  ;;  %v2272_v63 = vld [vmem:[%s2756_s30 + $0x2dc] sm:$0xf0]  ;;  %v2454_v58 = vld [vmem:[%s2756_s30 + $0x1a8] sm:$0xf0] }
  0xf4   : > { %1766 = vst [vmem:[%s2895_s20 + $0x38] sm:$0xff] %v1702_v5  ;;  %v1420_v10 = vadd.f32 %v1419_v33, %v1251_v6  ;;  %1289 = vmatmul.bf16.gmra.mxu1 %v2059_v3  ;;  %v2275_v5 = vor.u32 %v2491_v62, %v2272_v63 }
  0xf6   : > { %v1571_v12 = vmul.f32 %v2878_v7, %v1420_v10  ;;  %v2967_v13 = vpop.f32.mrf.mxu3 }
  0xf8   : > { %v1639_v16 = vadd.f32 %v2884_v9, %v1571_v12  ;;  %v1426_v17 = vpop.f32.mrf.mxu2  ;;  %v1083_v18 = vpop.f32.mrf.mxu0 }
  0xf9   : > { %v1252_v19 = vpop.f32.mrf.mxu1 }
  0xfa   : > { %v1703_v21 = vmax.f32 %v1639_v16, 0.0  ;;  %v1253_v22 = vadd.f32 %v1252_v19, %v1083_v18 }
  0xfc   : > { %1767 = vst [vmem:[%s2895_s20 + $0x40] sm:$0xff] %v1703_v21  ;;  %v1422_v25 = vadd.f32 %v1421_v46, %v1253_v22  ;;  %v2110_v21 = vld [vmem:[%s2756_s30 + $0x188] sm:$0xf]  ;;  %v2451_v22 = vld [vmem:[%s2756_s30 + $0x190] sm:$0xf0] }
  0xfd   : > { %2378 = vmatmul.msk.bf16.gmra.mxu2 %vm955_vm0, %v2087_v20  ;;  %v2111_v27 = vor.u32 %v2451_v22, %v2110_v21 }
  0xfe   : > { %v1572_v32 = vmul.f32 %v2878_v7, %v1422_v25  ;;  %v2981_v33 = vpop.f32.mrf.mxu3 }
 0x100   : > { %v1640_v36 = vadd.f32 %v2884_v9, %v1572_v32  ;;  %v1429_v37 = vpop.f32.mrf.mxu2  ;;  %v1086_v38 = vpop.f32.mrf.mxu0  ;;  %v2090_v32 = vld [vmem:[%s2756_s30 + $0x168] sm:$0xf] }
 0x101   : > { %v1255_v40 = vpop.f32.mrf.mxu1 }
 0x102   : > { %v1704_v43 = vmax.f32 %v1640_v36, 0.0  ;;  %v1256_v44 = vadd.f32 %v1255_v40, %v1086_v38  ;;  %v2494_v36 = vld [vmem:[%s2756_s30 + $0x2ec] sm:$0xf] }
 0x103   : > { %1125 = vmatmul.bf16.gmra.mxu0 %v2067_v34  ;;  %1374 = vmatmul.bf16.gmra.mxu3 %v2263_v35  ;;  %v2447_v34 = vld [vmem:[%s2756_s30 + $0x170] sm:$0xf0]  ;;  %v2446_v38 = vld [vmem:[%s2756_s30 + $0x16c] sm:$0xf] }
 0x104   : > { %1768 = vst [vmem:[%s2895_s20 + $0x48] sm:$0xff] %v1704_v43  ;;  %v1425_v45 = vadd.f32 %v1424_v1, %v1256_v44  ;;  %1294 = vmatmul.bf16.gmra.mxu1 %v2071_v39  ;;  %v2080_v1 = vld [vmem:[%s2756_s30 + $0x15c] sm:$0xf0]  ;;  %v2092_v39 = vld [vmem:[%s2756_s30 + $0x174] sm:$0xf0]  ;;  %v2091_v44 = vor.u32 %v2447_v34, %v2090_v32 }
 0x105   : > { %v2083_v14 = vor.u32 %v2443_v0, %v2080_v1  ;;  %v2123_v1 = vor.u32 %v2454_v58, %v2122_v57 }
 0x106   : > { %v1573_v46 = vmul.f32 %v2878_v7, %v1425_v45  ;;  %v2986_v47 = vpop.f32.mrf.mxu3 }
 0x108   : > { %v1641_v50 = vadd.f32 %v2884_v9, %v1573_v46  ;;  %v1431_v51 = vpop.f32.mrf.mxu2  ;;  %v1088_v52 = vpop.f32.mrf.mxu0 }
 0x109   : > { %v1257_v53 = vpop.f32.mrf.mxu1 }
 0x10a   : > { %v1705_v55 = vmax.f32 %v1641_v50, 0.0  ;;  %v1258_v56 = vadd.f32 %v1257_v53, %v1088_v52  ;;  %v2095_v50 = vor.u32 %v2446_v38, %v2092_v39 }
 0x10c   : > { %1769 = vst [vmem:[%s2895_s20 + $0x50] sm:$0xff] %v1705_v55  ;;  %v1427_v60 = vadd.f32 %v1426_v17, %v1258_v56 }
 0x10d   : > { %2379 = vmatmul.msk.bf16.gmra.mxu2 %vm955_vm0, %v2099_v54 }
 0x10e   : > { %v1574_v2 = vmul.f32 %v2878_v7, %v1427_v60  ;;  %v3000_v3 = vpop.f32.mrf.mxu3 }
 0x110   : > { %v1642_v6 = vadd.f32 %v2884_v9, %v1574_v2  ;;  %v1434_v10 = vpop.f32.mrf.mxu2  ;;  %v1091_v12 = vpop.f32.mrf.mxu0 }
 0x111   : > { %v1260_v15 = vpop.f32.mrf.mxu1 }
 0x112   : > { %v1706_v16 = vmax.f32 %v1642_v6, 0.0  ;;  %v1261_v17 = vadd.f32 %v1260_v15, %v1091_v12  ;;  %v2450_v6 = vld [vmem:[%s2756_s30 + $0x188] sm:$0xf0]  ;;  %v2230_v12 = vld [vmem:[%s2756_s30 + $0x278] sm:$0xf] }
 0x113   : > { %1130 = vmatmul.bf16.gmra.mxu0 %v2079_v4  ;;  %1379 = vmatmul.bf16.gmra.mxu3 %v2275_v5  ;;  %v2102_v5 = vld [vmem:[%s2756_s30 + $0x180] sm:$0xf]  ;;  %v2449_v15 = vld [vmem:[%s2756_s30 + $0x184] sm:$0xf] }
 0x114   : > { %1770 = vst [vmem:[%s2895_s20 + $0x58] sm:$0xff] %v1706_v16  ;;  %v1430_v18 = vadd.f32 %v1429_v37, %v1261_v17  ;;  %1299 = vmatmul.bf16.gmra.mxu1 %v2083_v14  ;;  %v2284_v37 = vld [vmem:[%s2756_s30 + $0x2f4] sm:$0xf0]  ;;  %v2481_v14 = vld [vmem:[%s2756_s30 + $0x280] sm:$0xf0] }
 0x115   : > { %v2287_v45 = vor.u32 %v2494_v36, %v2284_v37  ;;  %v2104_v16 = vld [vmem:[%s2756_s30 + $0x18c] sm:$0xf0]  ;;  %v2231_v21 = vor.u32 %v2481_v14, %v2230_v12  ;;  %v2457_v36 = vld [vmem:[%s2756_s30 + $0x1c0] sm:$0xf0] }
 0x116   : > { %v1575_v19 = vmul.f32 %v2878_v7, %v1430_v18  ;;  %v3005_v20 = vpop.f32.mrf.mxu3  ;;  %v2146_v14 = vld [vmem:[%s2756_s30 + $0x1d0] sm:$0xf] }
 0x118   : > { %v1643_v23 = vadd.f32 %v2884_v9, %v1575_v19  ;;  %v1436_v24 = vpop.f32.mrf.mxu2  ;;  %v1093_v25 = vpop.f32.mrf.mxu0  ;;  %v2103_v19 = vor.u32 %v2450_v6, %v2102_v5 }
 0x119   : > { %v1262_v26 = vpop.f32.mrf.mxu1 }
 0x11a   : > { %v1707_v30 = vmax.f32 %v1643_v23, 0.0  ;;  %v1263_v31 = vadd.f32 %v1262_v26, %v1093_v25 }
 0x11c   : > { %1771 = vst [vmem:[%s2895_s20 + $0x60] sm:$0xff] %v1707_v30  ;;  %v1432_v35 = vadd.f32 %v1431_v51, %v1263_v31 }
 0x11d   : > { %2380 = vmatmul.msk.bf16.gmra.mxu2 %vm955_vm0, %v2111_v27 }
 0x11e   : > { %v1576_v40 = vmul.f32 %v2878_v7, %v1432_v35  ;;  %v3019_v43 = vpop.f32.mrf.mxu3  ;;  %v2134_v35 = vld [vmem:[%s2756_s30 + $0x1b8] sm:$0xf] }
 0x120   : > { %v1644_v46 = vadd.f32 %v2884_v9, %v1576_v40  ;;  %v1439_v48 = vpop.f32.mrf.mxu2  ;;  %v1096_v49 = vpop.f32.mrf.mxu0 }
 0x121   : > { %v1265_v51 = vpop.f32.mrf.mxu1 }
 0x122   : > { %v1708_v52 = vmax.f32 %v1644_v46, 0.0  ;;  %v1266_v53 = vadd.f32 %v1265_v51, %v1096_v49  ;;  %v2453_v49 = vld [vmem:[%s2756_s30 + $0x1a0] sm:$0xf0]  ;;  %v2242_v51 = vld [vmem:[%s2756_s30 + $0x290] sm:$0xf] }
 0x123   : > { %1135 = vmatmul.bf16.gmra.mxu0 %v2091_v44  ;;  %1384 = vmatmul.bf16.gmra.mxu3 %v2287_v45  ;;  %v2135_v44 = vor.u32 %v2457_v36, %v2134_v35  ;;  %v2128_v35 = vld [vmem:[%s2756_s30 + $0x1bc] sm:$0xf0] }
 0x124   : > { %1772 = vst [vmem:[%s2895_s20 + $0x68] sm:$0xff] %v1708_v52  ;;  %v1435_v54 = vadd.f32 %v1434_v10, %v1266_v53  ;;  %1304 = vmatmul.bf16.gmra.mxu1 %v2095_v50  ;;  %v2484_v52 = vld [vmem:[%s2756_s30 + $0x298] sm:$0xf0] }
 0x125   : > { %v2452_v53 = vld [vmem:[%s2756_s30 + $0x19c] sm:$0xf] }
 0x126   : > { %v1577_v55 = vmul.f32 %v2878_v7, %v1435_v54  ;;  %v3024_v56 = vpop.f32.mrf.mxu3  ;;  %v2116_v54 = vld [vmem:[%s2756_s30 + $0x1a4] sm:$0xf0] }
 0x128   : > { %v1645_v60 = vadd.f32 %v2884_v9, %v1577_v55  ;;  %v1441_v62 = vpop.f32.mrf.mxu2  ;;  %v1098_v63 = vpop.f32.mrf.mxu0 }
 0x129   : > { %v1267_v0 = vpop.f32.mrf.mxu1 }
 0x12a   : > { %v1709_v2 = vmax.f32 %v1645_v60, 0.0  ;;  %v1268_v4 = vadd.f32 %v1267_v0, %v1098_v63  ;;  %v2243_v60 = vor.u32 %v2484_v52, %v2242_v51 }
 0x12c   : > { %1773 = vst [vmem:[%s2895_s20 + $0x70] sm:$0xff] %v1709_v2  ;;  %v1437_v10 = vadd.f32 %v1436_v24, %v1268_v4  ;;  %v2107_v24 = vor.u32 %v2449_v15, %v2104_v16  ;;  %v2460_v15 = vld [vmem:[%s2756_s30 + $0x1d8] sm:$0xf0] }
 0x12d   : > { %2381 = vmatmul.msk.bf16.gmra.mxu2 %vm955_vm0, %v2123_v1 }
 0x12e   : > { %v1578_v17 = vmul.f32 %v2878_v7, %v1437_v10  ;;  %v3038_v18 = vpop.f32.mrf.mxu3 }
 0x130   : > { %v1646_v22 = vadd.f32 %v2884_v9, %v1578_v17  ;;  %v1444_v23 = vpop.f32.mrf.mxu2  ;;  %v1101_v25 = vpop.f32.mrf.mxu0 }
 0x131   : > { %v1270_v26 = vpop.f32.mrf.mxu1 }
 0x132   : > { %v1710_v27 = vmax.f32 %v1646_v22, 0.0  ;;  %v1271_v30 = vadd.f32 %v1270_v26, %v1101_v25  ;;  %v2147_v22 = vor.u32 %v2460_v15, %v2146_v14  ;;  %v2456_v26 = vld [vmem:[%s2756_s30 + $0x1b8] sm:$0xf0]  ;;  %v2490_v14 = vld [vmem:[%s2756_s30 + $0x2c8] sm:$0xf0] }
 0x133   : > { %1140 = vmatmul.bf16.gmra.mxu0 %v2103_v19  ;;  %2390 = vmatmul.msk.bf16.vlgmr.msra.gmra.mxu3 %vm955_vm0, %v2231_v21  ;;  %v2458_v15 = vld [vmem:[%s2756_s30 + $0x1cc] sm:$0xf] }
 0x134   : > { %1774 = vst [vmem:[%s2895_s20 + $0x78] sm:$0xff] %v1710_v27  ;;  %v1440_v31 = vadd.f32 %v1439_v48, %v1271_v30  ;;  %1309 = vmatmul.bf16.gmra.mxu1 %v2107_v24  ;;  %v2114_v48 = vld [vmem:[%s2756_s30 + $0x198] sm:$0xf]  ;;  %v2254_v30 = vld [vmem:[%s2756_s30 + $0x2a8] sm:$0xf] }
 0x135   : > { %v2115_v58 = vor.u32 %v2453_v49, %v2114_v48 }
 0x136   : > { %v1579_v32 = vmul.f32 %v2878_v7, %v1440_v31  ;;  %v3044_v34 = vpop.f32.mrf.mxu3  ;;  %v2487_v31 = vld [vmem:[%s2756_s30 + $0x2b0] sm:$0xf0] }
 0x138   : > { %v1647_v37 = vadd.f32 %v2884_v9, %v1579_v32  ;;  %v1446_v38 = vpop.f32.mrf.mxu2  ;;  %v1103_v39 = vpop.f32.mrf.mxu0  ;;  %v2455_v32 = vld [vmem:[%s2756_s30 + $0x1b4] sm:$0xf] }
 0x139   : > { %v1272_v40 = vpop.f32.mrf.mxu1 }
 0x13a   : > { %v1711_v45 = vmax.f32 %v1647_v37, 0.0  ;;  %v1273_v46 = vadd.f32 %v1272_v40, %v1103_v39  ;;  %v2255_v40 = vor.u32 %v2487_v31, %v2254_v30 }
 0x13c   : > { %1775 = vst [vmem:[%s2895_s20 + $0x80] sm:$0xff] %v1711_v45  ;;  %v1442_v50 = vadd.f32 %v1441_v62, %v1273_v46  ;;  %v2119_v62 = vor.u32 %v2452_v53, %v2116_v54  ;;  %v2158_v54 = vld [vmem:[%s2756_s30 + $0x1e8] sm:$0xf] }
 0x13d   : > { %2382 = vmatmul.msk.bf16.gmra.mxu2 %vm955_vm0, %v2135_v44 }
 0x13e   : > { %v1580_v55 = vmul.f32 %v2878_v7, %v1442_v50  ;;  %v3058_v57 = vpop.f32.mrf.mxu3 }
 0x140   : > { %v1648_v63 = vadd.f32 %v2884_v9, %v1580_v55  ;;  %v1449_v0 = vpop.f32.mrf.mxu2  ;;  %v1106_v1 = vpop.f32.mrf.mxu0  ;;  %v2463_v55 = vld [vmem:[%s2756_s30 + $0x1f0] sm:$0xf0] }
 0x141   : > { %v1275_v2 = vpop.f32.mrf.mxu1 }
 0x142   : > { %v1712_v4 = vmax.f32 %v1648_v63, 0.0  ;;  %v1276_v5 = vadd.f32 %v1275_v2, %v1106_v1 }
 0x143   : > { %1145 = vmatmul.bf16.gmra.mxu0 %v2115_v58  ;;  %2391 = vmatmul.msk.bf16.gmra.mxu3 %vm955_vm0, %v2243_v60 }
 0x144   : > { %1776 = vst [vmem:[%s2895_s20 + $0x88] sm:$0xff] %v1712_v4  ;;  %v1445_v6 = vadd.f32 %v1444_v23, %v1276_v5  ;;  %1314 = vmatmul.bf16.gmra.mxu1 %v2119_v62  ;;  %v2126_v23 = vld [vmem:[%s2756_s30 + $0x1b0] sm:$0xf]  ;;  %v2159_v62 = vor.u32 %v2463_v55, %v2158_v54  ;;  %v2459_v5 = vld [vmem:[%s2756_s30 + $0x1d0] sm:$0xf0] }
 0x145   : > { %v2127_v39 = vor.u32 %v2456_v26, %v2126_v23  ;;  %v2278_v55 = vld [vmem:[%s2756_s30 + $0x2d8] sm:$0xf] }
 0x146   : > { %v1581_v10 = vmul.f32 %v2878_v7, %v1445_v6  ;;  %v3064_v12 = vpop.f32.mrf.mxu3 }
 0x148   : > { %v1649_v16 = vadd.f32 %v2884_v9, %v1581_v10  ;;  %v1451_v17 = vpop.f32.mrf.mxu2  ;;  %v1108_v19 = vpop.f32.mrf.mxu0  ;;  %v2266_v10 = vld [vmem:[%s2756_s30 + $0x2c0] sm:$0xf] }
 0x149   : > { %v1277_v21 = vpop.f32.mrf.mxu1 }
 0x14a   : > { %v1713_v25 = vmax.f32 %v1649_v16, 0.0  ;;  %v1278_v24 = vadd.f32 %v1277_v21, %v1108_v19  ;;  %v2140_v16 = vld [vmem:[%s2756_s30 + $0x1d4] sm:$0xf0] }
 0x14c   : > { %1777 = vst [vmem:[%s2895_s20 + $0x90] sm:$0xff] %v1713_v25  ;;  %v1447_v27 = vadd.f32 %v1446_v38, %v1278_v24  ;;  %v2131_v38 = vor.u32 %v2455_v32, %v2128_v35  ;;  %v2267_v25 = vor.u32 %v2490_v14, %v2266_v10 }
 0x14d   : > { %2383 = vmatmul.msk.bf16.gmra.mxu2 %vm955_vm0, %v2147_v22 }
 0x14e   : > { %v1582_v36 = vmul.f32 %v2878_v7, %v1447_v27  ;;  %v3078_v37 = vpop.f32.mrf.mxu3 }
 0x150   : > { %v1650_v44 = vadd.f32 %v2884_v9, %v1582_v36  ;;  %v1454_v45 = vpop.f32.mrf.mxu2  ;;  %v1111_v46 = vpop.f32.mrf.mxu0 }
 0x151   : > { %v1280_v48 = vpop.f32.mrf.mxu1 }
 0x152   : > { %v1714_v49 = vmax.f32 %v1650_v44, 0.0  ;;  %v1281_v50 = vadd.f32 %v1280_v48, %v1111_v46 }
 0x153   : > { %1150 = vmatmul.bf16.gmra.mxu0 %v2127_v39  ;;  %2392 = vmatmul.msk.bf16.gmra.mxu3 %vm955_vm0, %v2255_v40  ;;  %v2170_v39 = vld [vmem:[%s2756_s30 + $0x200] sm:$0xf]  ;;  %v2466_v40 = vld [vmem:[%s2756_s30 + $0x208] sm:$0xf0] }
 0x154   : > { %1778 = vst [vmem:[%s2895_s20 + $0x98] sm:$0xff] %v1714_v49  ;;  %v1450_v51 = vadd.f32 %v1449_v0, %v1281_v50  ;;  %1319 = vmatmul.bf16.gmra.mxu1 %v2131_v38  ;;  %v2138_v0 = vld [vmem:[%s2756_s30 + $0x1c8] sm:$0xf]  ;;  %v2171_v49 = vor.u32 %v2466_v40, %v2170_v39  ;;  %v2465_v40 = vld [vmem:[%s2756_s30 + $0x200] sm:$0xf0] }
 0x155   : > { %v2139_v22 = vor.u32 %v2459_v5, %v2138_v0 }
 0x156   : > { %v1583_v52 = vmul.f32 %v2878_v7, %v1450_v51  ;;  %v3084_v53 = vpop.f32.mrf.mxu3 }
 0x158   : > { %v1651_v58 = vadd.f32 %v2884_v9, %v1583_v52  ;;  %v1456_v60 = vpop.f32.mrf.mxu2  ;;  %v1113_v63 = vpop.f32.mrf.mxu0  ;;  %v2462_v52 = vld [vmem:[%s2756_s30 + $0x1e8] sm:$0xf0] }
 0x159   : > { %v1282_v1 = vpop.f32.mrf.mxu1 }
 0x15a   : > { %v1715_v2 = vmax.f32 %v1651_v58, 0.0  ;;  %v1283_v4 = vadd.f32 %v1282_v1, %v1113_v63  ;;  %v2493_v58 = vld [vmem:[%s2756_s30 + $0x2e0] sm:$0xf0]  ;;  %v2152_v1 = vld [vmem:[%s2756_s30 + $0x1ec] sm:$0xf0] }
 0x15b   : > { %v2461_v63 = vld [vmem:[%s2756_s30 + $0x1e4] sm:$0xf]  ;;  %v2279_v0 = vor.u32 %v2493_v58, %v2278_v55 }
 0x15c   : > { %1779 = vst [vmem:[%s2895_s20 + $0xa0] sm:$0xff] %v1715_v2  ;;  %v1452_v6 = vadd.f32 %v1451_v17, %v1283_v4  ;;  %v2143_v17 = vor.u32 %v2458_v15, %v2140_v16 }
 0x15d   : > { %2384 = vmatmul.msk.bf16.gmra.mxu2 %vm955_vm0, %v2159_v62 }
 0x15e   : > { %v1584_v19 = vmul.f32 %v2878_v7, %v1452_v6  ;;  %v3098_v21 = vpop.f32.mrf.mxu3 }
 0x160   : > { %v1652_v24 = vadd.f32 %v2884_v9, %v1584_v19  ;;  %v1459_v23 = vpop.f32.mrf.mxu2  ;;  %v1116_v26 = vpop.f32.mrf.mxu0 }
 0x161   : > { %v1285_v27 = vpop.f32.mrf.mxu1 }
 0x162   : > { %v1716_v30 = vmax.f32 %v1652_v24, 0.0  ;;  %v1286_v31 = vadd.f32 %v1285_v27, %v1116_v26  ;;  %v2182_v24 = vld [vmem:[%s2756_s30 + $0x218] sm:$0xf]  ;;  %v2469_v26 = vld [vmem:[%s2756_s30 + $0x220] sm:$0xf0] }
 0x163   : > { %1155 = vmatmul.bf16.gmra.mxu0 %v2139_v22  ;;  %2393 = vmatmul.msk.bf16.gmra.mxu3 %vm955_vm0, %v2267_v25 }
 0x164   : > { %1780 = vst [vmem:[%s2895_s20 + $0xa8] sm:$0xff] %v1716_v30  ;;  %v1455_v32 = vadd.f32 %v1454_v45, %v1286_v31  ;;  %1324 = vmatmul.bf16.gmra.mxu1 %v2143_v17  ;;  %v2150_v45 = vld [vmem:[%s2756_s30 + $0x1e0] sm:$0xf] }
 0x165   : > { %v2151_v4 = vor.u32 %v2462_v52, %v2150_v45 }
 0x166   : > { %v1585_v35 = vmul.f32 %v2878_v7, %v1455_v32  ;;  %v3104_v36 = vpop.f32.mrf.mxu3  ;;  %v2183_v32 = vor.u32 %v2469_v26, %v2182_v24 }
 0x168   : > { %v1653_v44 = vadd.f32 %v2884_v9, %v1585_v35  ;;  %v1461_v46 = vpop.f32.mrf.mxu2  ;;  %v1118_v38 = vpop.f32.mrf.mxu0 }
 0x169   : > { %v1287_v48 = vpop.f32.mrf.mxu1 }
 0x16a   : > { %v1717_v50 = vmax.f32 %v1653_v44, 0.0  ;;  %v1288_v51 = vadd.f32 %v1287_v48, %v1118_v38  ;;  %v2290_v38 = vld [vmem:[%s2756_s30 + $0x2f0] sm:$0xf]  ;;  %v2496_v48 = vld [vmem:[%s2756_s30 + $0x2f8] sm:$0xf0] }
 0x16c   : > { %1781 = vst [vmem:[%s2895_s20 + $0xb0] sm:$0xff] %v1717_v50  ;;  %v1457_v54 = vadd.f32 %v1456_v60, %v1288_v51  ;;  %v2155_v60 = vor.u32 %v2461_v63, %v2152_v1  ;;  %v2164_v50 = vld [vmem:[%s2756_s30 + $0x204] sm:$0xf0] }
 0x16d   : > { %2385 = vmatmul.msk.bf16.gmra.mxu2 %vm955_vm0, %v2171_v49  ;;  %v2464_v49 = vld [vmem:[%s2756_s30 + $0x1fc] sm:$0xf] }
 0x16e   : > { %v1586_v62 = vmul.f32 %v2878_v7, %v1457_v54  ;;  %v3118_v2 = vpop.f32.mrf.mxu3  ;;  %v2291_v54 = vor.u32 %v2496_v48, %v2290_v38 }
 0x170   : > { %v1654_v5 = vadd.f32 %v2884_v9, %v1586_v62  ;;  %v1464_v6 = vpop.f32.mrf.mxu2  ;;  %v1121_v10 = vpop.f32.mrf.mxu0 }
 0x171   : > { %v1290_v14 = vpop.f32.mrf.mxu1 }
 0x172   : > { %v1718_v15 = vmax.f32 %v1654_v5, 0.0  ;;  %v1291_v16 = vadd.f32 %v1290_v14, %v1121_v10  ;;  %v2472_v14 = vld [vmem:[%s2756_s30 + $0x238] sm:$0xf0] }
 0x173   : > { %1160 = vmatmul.bf16.gmra.mxu0 %v2151_v4  ;;  %2394 = vmatmul.msk.bf16.gmra.mxu3 %vm955_vm0, %v2279_v0 }
 0x174   : > { %1782 = vst [vmem:[%s2895_s20 + $0xb8] sm:$0xff] %v1718_v15  ;;  %v1460_v19 = vadd.f32 %v1459_v23, %v1291_v16  ;;  %1329 = vmatmul.bf16.gmra.mxu1 %v2155_v60  ;;  %v2162_v23 = vld [vmem:[%s2756_s30 + $0x1f8] sm:$0xf]  ;;  %v2194_v60 = vld [vmem:[%s2756_s30 + $0x230] sm:$0xf] }
 0x175   : > { %v2163_v52 = vor.u32 %v2465_v40, %v2162_v23  ;;  %v2195_v24 = vor.u32 %v2472_v14, %v2194_v60 }
 0x176   : > { %v1587_v22 = vmul.f32 %v2878_v7, %v1460_v19  ;;  %v3124_v25 = vpop.f32.mrf.mxu3 }
 0x178   : > { %v1655_v17 = vadd.f32 %v2884_v9, %v1587_v22  ;;  %v1466_v27 = vpop.f32.mrf.mxu2  ;;  %v1123_v30 = vpop.f32.mrf.mxu0 }
 0x179   : > { %v1292_v31 = vpop.f32.mrf.mxu1 }
 0x17a   : > { %v1719_v35 = vmax.f32 %v1655_v17, 0.0  ;;  %v1293_v39 = vadd.f32 %v1292_v31, %v1123_v30  ;;  %v2174_v30 = vld [vmem:[%s2756_s30 + $0x210] sm:$0xf]  ;;  %v2468_v31 = vld [vmem:[%s2756_s30 + $0x218] sm:$0xf0] }
 0x17b   : > { %v2175_v40 = vor.u32 %v2468_v31, %v2174_v30 }
 0x17c   : > { %1783 = vst [vmem:[%s2895_s20 + $0xc0] sm:$0xff] %v1719_v35  ;;  %v1462_v44 = vadd.f32 %v1461_v46, %v1293_v39  ;;  %v2167_v46 = vor.u32 %v2464_v49, %v2164_v50  ;;  %v2176_v35 = vld [vmem:[%s2756_s30 + $0x21c] sm:$0xf0] }
 0x17d   : > { %2386 = vmatmul.msk.bf16.gmra.mxu2 %vm955_vm0, %v2183_v32  ;;  %v2467_v32 = vld [vmem:[%s2756_s30 + $0x214] sm:$0xf] }
 0x17e   : > { %v1588_v51 = vmul.f32 %v2878_v7, %v1462_v44  ;;  %v3138_v45 = vpop.f32.mrf.mxu3  ;;  %v2179_v49 = vor.u32 %v2467_v32, %v2176_v35 }
 0x180   : > { %v1656_v55 = vadd.f32 %v2884_v9, %v1588_v51  ;;  %v1469_v58 = vpop.f32.mrf.mxu2  ;;  %v1126_v63 = vpop.f32.mrf.mxu0 }
 0x181   : > { %v1295_v1 = vpop.f32.mrf.mxu1 }
 0x182   : > { %v1720_v62 = vmax.f32 %v1656_v55, 0.0  ;;  %v1296_v4 = vadd.f32 %v1295_v1, %v1126_v63  ;;  %v2206_v63 = vld [vmem:[%s2756_s30 + $0x248] sm:$0xf] }
 0x183   : > { %1165 = vmatmul.bf16.gmra.mxu0 %v2163_v52  ;;  %2395 = vmatmul.msk.bf16.gmra.mxu3 %vm955_vm0, %v2291_v54 }
 0x184   : > { %1784 = vst [vmem:[%s2895_s20 + $0xc8] sm:$0xff] %v1720_v62  ;;  %v1465_v0 = vadd.f32 %v1464_v6, %v1296_v4  ;;  %1334 = vmatmul.bf16.gmra.mxu1 %v2167_v46  ;;  %v2475_v46 = vld [vmem:[%s2756_s30 + $0x250] sm:$0xf0] }
 0x186   : > { %v1589_v5 = vmul.f32 %v2878_v7, %v1465_v0  ;;  %v3144_v10 = vpop.f32.mrf.mxu3 }
 0x188   : > { %v1657_v15 = vadd.f32 %v2884_v9, %v1589_v5  ;;  %v1471_v16 = vpop.f32.mrf.mxu2  ;;  %v1128_v19 = vpop.f32.mrf.mxu0  ;;  %v2207_v5 = vor.u32 %v2475_v46, %v2206_v63 }
 0x189   : > { %v1297_v22 = vpop.f32.mrf.mxu1 }
 0x18a   : > { %v1721_v26 = vmax.f32 %v1657_v15, 0.0  ;;  %v1298_v17 = vadd.f32 %v1297_v22, %v1128_v19  ;;  %v2186_v15 = vld [vmem:[%s2756_s30 + $0x228] sm:$0xf]  ;;  %v2471_v19 = vld [vmem:[%s2756_s30 + $0x230] sm:$0xf0] }
 0x18b   : > { %v2188_v22 = vld [vmem:[%s2756_s30 + $0x234] sm:$0xf0] }
 0x18c   : > { %1785 = vst [vmem:[%s2895_s20 + $0xd0] sm:$0xff] %v1721_v26  ;;  %v1467_v6 = vadd.f32 %v1466_v27, %v1298_v17  ;;  %v2187_v17 = vor.u32 %v2471_v19, %v2186_v15 }
 0x18d   : > { %2387 = vmatmul.msk.bf16.gmra.mxu2 %vm955_vm0, %v2195_v24  ;;  %v3175_v24 = vld [vmem:[%s3364_s2] ss:$0 sm:$0xff] }
 0x18e   : > { %v1590_v39 = vmul.f32 %v2878_v7, %v1467_v6  ;;  %v3156_v23 = vpop.f32.mrf.mxu3 }
 0x190   : > { %v1658_v44 = vadd.f32 %v2884_v9, %v1590_v39  ;;  %v1474_v38 = vpop.f32.mrf.mxu2  ;;  %v1131_v48 = vpop.f32.mrf.mxu0 }
 0x191   : > { %v1300_v27 = vpop.f32.mrf.mxu1 }
 0x192   : > { %v1722_v50 = vmax.f32 %v1658_v44, 0.0  ;;  %v1301_v51 = vadd.f32 %v1300_v27, %v1131_v48  ;;  %v2218_v27 = vld [vmem:[%s2756_s30 + $0x260] sm:$0xf] }
 0x193   : > { %1170 = vmatmul.bf16.gmra.mxu0 %v2175_v40 }
 0x194   : > { %1786 = vst [vmem:[%s2895_s20 + $0xd8] sm:$0xff] %v1722_v50  ;;  %v1470_v52 = vadd.f32 %v1469_v58, %v1301_v51  ;;  %1339 = vmatmul.bf16.gmra.mxu1 %v2179_v49  ;;  %v2478_v50 = vld [vmem:[%s2756_s30 + $0x268] sm:$0xf0] }
 0x195   : > { %v2219_v46 = vor.u32 %v2478_v50, %v2218_v27 }
 0x196   : > { %v1591_v54 = vmul.f32 %v2878_v7, %v1470_v52  ;;  %v3161_v55 = vpop.f32.mrf.mxu3  ;;  %v2470_v7 = vld [vmem:[%s2756_s30 + $0x22c] sm:$0xf]  ;;  %s2515_s30 = sshll.u32 %s2692_s19, 9  ;;  %s1824_s19 = scalar_lea.sflag [#allocation3], %s191_s11 }
 0x197   : > { %v2191_v32 = vor.u32 %v2470_v7, %v2188_v22  ;;  %s1835_s6 = scalar_lea.hbm %s3366_s4, %s2515_s30 }
 0x198   : > { %v1659_v1 = vadd.f32 %v2884_v9, %v1591_v54  ;;  %v1476_v62 = vpop.f32.mrf.mxu2  ;;  %v1133_v4 = vpop.f32.mrf.mxu0  ;;  %s1838_s8 = sshll.u32 %s1835_s6, 4  ;;  %s1839_s8 = int_to_ptr.hbm [resolvable:$true] %s1838_s8 }
 0x199   : > { %v1302_v0 = vpop.f32.mrf.mxu1  ;;  %s2594_s9 = sshra.s32 %s1839_s8, 4  ;;  %s2595_s9 = int_to_ptr.hbm [resolvable:$true] %s2594_s9 }
 0x19a   : > { %v1723_v60 = vmax.f32 %v1659_v1, 0.0  ;;  %v1303_v14 = vadd.f32 %v1302_v0, %v1133_v4  ;;  %s2596_s10 = scalar_lea.hbm %s2595_s9, 512  ;;  %p2601_p0 = scmp.lt.s32.totalorder %s2595_s9, %s3366_s4 }
 0x19b   : > { %p2597_p11 = scmp.ne.s32.totalorder %s2595_s9, %s2596_s10  ;;  %p2602_p1 = scmp.lt.s32.totalorder %s2600_s14, %s2596_s10 }
 0x19c   : > { %1787 = vst [vmem:[%s2895_s20 + $0xe0] sm:$0xff] %v1723_v60  ;;  %v1472_v58 = vadd.f32 %v1471_v16, %v1303_v14  ;;  %v3183_v16 = vld [vmem:[%s3365_s3] ss:$0 sm:$0xff] }
 0x19d   : > { %2388 = vmatmul.msk.bf16.gmra.mxu2 %vm955_vm0, %v2207_v5  ;;  %p2598_p12 = pnand %p2597_p11, %p2709_p5  ;;  %p2603_p2 = por %p2602_p1, %p2601_p0 }
 0x19e   : > { %v1592_v9 = vmul.f32 %v3175_v24, %v1472_v58  ;;  %v3178_v26 = vpop.f32.mrf.mxu3 }
 0x19f   : > { %p2599_p13 = pneg %p2598_p12 }
 0x1a0   : > { %v1660_v6 = vadd.f32 %v3183_v16, %v1592_v9  ;;  %v1479_v30 = vpop.f32.mrf.mxu2  ;;  %v1136_v31 = vpop.f32.mrf.mxu0  ;;  %v1361_v9 = vadd.f32 %v3084_v53, %v2929_v8  ;;  %v1363_v8 = vadd.f32 %v3098_v21, %v2943_v28  ;;  %v1366_v21 = vadd.f32 %v3104_v36, %v2948_v42 }
 0x1a1   : > { %v1305_v35 = vpop.f32.mrf.mxu1  ;;  %v1368_v36 = vadd.f32 %v3118_v2, %v2962_v61  ;;  %v1371_v2 = vadd.f32 %v3124_v25, %v2967_v13  ;;  %v1373_v25 = vadd.f32 %v3138_v45, %v2981_v33  ;;  %v1376_v45 = vadd.f32 %v3144_v10, %v2986_v47  ;;  %p2604_p3 = pnand %p2603_p2, %p2599_p13 }
 0x1a2   : > { %v1724_v39 = vmax.f32 %v1660_v6, 0.0  ;;  %v1306_v40 = vadd.f32 %v1305_v35, %v1136_v31  ;;  %v1378_v10 = vadd.f32 %v3156_v23, %v3000_v3  ;;  %v1381_v23 = vadd.f32 %v3161_v55, %v3005_v20 }
 0x1a3   : > { %1175 = vmatmul.bf16.gmra.mxu0 %v2187_v17  ;;  %v1383_v55 = vadd.f32 %v3178_v26, %v3019_v43 }
 0x1a4   : > { %1788 = vst [vmem:[%s2895_s20 + $0xe8] sm:$0xff] %v1724_v39  ;;  %v1475_v44 = vadd.f32 %v1474_v38, %v1306_v40  ;;  %1344 = vmatmul.bf16.gmra.mxu1 %v2191_v32 }
 0x1a6   : > { %v1593_v48 = vmul.f32 %v3175_v24, %v1475_v44  ;;  %v3188_v49 = vpop.f32.mrf.mxu3 }
 0x1a7   : > { %v1386_v26 = vadd.f32 %v3188_v49, %v3024_v56 }
 0x1a8   : > { %v1661_v51 = vadd.f32 %v3183_v16, %v1593_v48  ;;  %v1481_v52 = vpop.f32.mrf.mxu2  ;;  %v1138_v54 = vpop.f32.mrf.mxu0 }
 0x1a9   : > { %v1307_v63 = vpop.f32.mrf.mxu1 }
 0x1aa   : > { %v1725_v1 = vmax.f32 %v1661_v51, 0.0  ;;  %v1308_v4 = vadd.f32 %v1307_v63, %v1138_v54 }
 0x1ac   : > { %1789 = vst [vmem:[%s2895_s20 + $0xf0] sm:$0xff] %v1725_v1  ;;  %v1477_v0 = vadd.f32 %v1476_v62, %v1308_v4 }
 0x1ad   : > { %2389 = vmatmul.msk.bf16.gmra.mxu2 %vm955_vm0, %v2219_v46 }
 0x1ae   : > { %v1594_v38 = vmul.f32 %v3175_v24, %v1477_v0  ;;  %v3196_v5 = vpop.f32.mrf.mxu3 }
 0x1af   : > { %v1388_v49 = vadd.f32 %v3196_v5, %v3038_v18 }
 0x1b0   : > { %v1662_v60 = vadd.f32 %v3183_v16, %v1594_v38  ;;  %v1484_v14 = vpop.f32.mrf.mxu2  ;;  %v1141_v58 = vpop.f32.mrf.mxu0 }
 0x1b1   : > { %v1310_v15 = vpop.f32.mrf.mxu1 }
 0x1b2   : > { %v1726_v19 = vmax.f32 %v1662_v60, 0.0  ;;  %v1311_v7 = vadd.f32 %v1310_v15, %v1141_v58 }
 0x1b4   : > { %1790 = vst [vmem:[%s2895_s20 + $0xf8] sm:$0xff] %v1726_v19  ;;  %v1480_v22 = vadd.f32 %v1479_v30, %v1311_v7 }
 0x1b6   : > { %v1595_v62 = vmul.f32 %v3175_v24, %v1480_v22  ;;  %v1529_v17 = vpop.f32.mrf.mxu3 }
 0x1b7   : > { %v1530_v6 = vadd.f32 %v1529_v17, %v1361_v9 }
 0x1b8   : > { %v1663_v31 = vadd.f32 %v3183_v16, %v1595_v62  ;;  %v1486_v32 = vpop.f32.mrf.mxu2  ;;  %v1143_v35 = vpop.f32.mrf.mxu0 }
 0x1b9   : > { %v1615_v39 = vmul.f32 %v3175_v24, %v1530_v6  ;;  %v1312_v40 = vpop.f32.mrf.mxu1 }
 0x1ba   : > { %v1727_v44 = vmax.f32 %v1663_v31, 0.0  ;;  %v1313_v48 = vadd.f32 %v1312_v40, %v1143_v35 }
 0x1bb   : > { %v1683_v27 = vadd.f32 %v3183_v16, %v1615_v39 }
 0x1bc   : > { %1791 = vst [vmem:[%s2895_s20 + $0x100] sm:$0xff] %v1727_v44  ;;  %v1482_v30 = vadd.f32 %v1481_v52, %v1313_v48 }
 0x1bd   : > { %v1747_v53 = vmax.f32 %v1683_v27, 0.0 }
 0x1be   : > { %v1596_v50 = vmul.f32 %v3175_v24, %v1482_v30  ;;  %v1531_v51 = vpop.f32.mrf.mxu3 }
 0x1bf   : > { %1811 = vst [vmem:[%s2895_s20 + $0x1a0] sm:$0xff] %v1747_v53  ;;  %v1532_v54 = vadd.f32 %v1531_v51, %v1363_v8 }
 0x1c0   : > { %v1664_v63 = vadd.f32 %v3183_v16, %v1596_v50  ;;  %v1489_v46 = vpop.f32.mrf.mxu2  ;;  %v1146_v1 = vpop.f32.mrf.mxu0 }
 0x1c1   : > { %v1616_v4 = vmul.f32 %v3175_v24, %v1532_v54  ;;  %v1315_v0 = vpop.f32.mrf.mxu1 }
 0x1c2   : > { %v1728_v38 = vmax.f32 %v1664_v63, 0.0  ;;  %v1316_v60 = vadd.f32 %v1315_v0, %v1146_v1 }
 0x1c3   : > { %v1684_v52 = vadd.f32 %v3183_v16, %v1616_v4 }
 0x1c4   : > { %1792 = vst [vmem:[%s2895_s20 + $0x108] sm:$0xff] %v1728_v38  ;;  %v1485_v28 = vadd.f32 %v1484_v14, %v1316_v60 }
 0x1c5   : > { %v1748_v58 = vmax.f32 %v1684_v52, 0.0 }
 0x1c6   : > { %v1597_v15 = vmul.f32 %v3175_v24, %v1485_v28  ;;  %v1534_v19 = vpop.f32.mrf.mxu3 }
 0x1c7   : > { %1812 = vst [vmem:[%s2895_s20 + $0x1a8] sm:$0xff] %v1748_v58  ;;  %v1535_v7 = vadd.f32 %v1534_v19, %v1366_v21 }
 0x1c8   : > { %v1665_v22 = vadd.f32 %v3183_v16, %v1597_v15  ;;  %v1491_v9 = vpop.f32.mrf.mxu2  ;;  %v1148_v62 = vpop.f32.mrf.mxu0 }
 0x1c9   : > { %v1617_v17 = vmul.f32 %v3175_v24, %v1535_v7  ;;  %v1317_v6 = vpop.f32.mrf.mxu1 }
 0x1ca   : > { %v1729_v31 = vmax.f32 %v1665_v22, 0.0  ;;  %v1318_v35 = vadd.f32 %v1317_v6, %v1148_v62 }
 0x1cb   : > { %v1685_v14 = vadd.f32 %v3183_v16, %v1617_v17 }
 0x1cc   : > { %1793 = vst [vmem:[%s2895_s20 + $0x110] sm:$0xff] %v1729_v31  ;;  %v1487_v42 = vadd.f32 %v1486_v32, %v1318_v35 }
 0x1cd   : > { %v1749_v39 = vmax.f32 %v1685_v14, 0.0 }
 0x1ce   : > { %v1598_v40 = vmul.f32 %v3175_v24, %v1487_v42  ;;  %v1536_v44 = vpop.f32.mrf.mxu3 }
 0x1cf   : > { %1813 = vst [vmem:[%s2895_s20 + $0x1b0] sm:$0xff] %v1749_v39  ;;  %v1537_v48 = vadd.f32 %v1536_v44, %v1368_v36 }
 0x1d0   : > { %v1666_v27 = vadd.f32 %v3183_v16, %v1598_v40  ;;  %v1494_v30 = vpop.f32.mrf.mxu2  ;;  %v1151_v8 = vpop.f32.mrf.mxu0 }
 0x1d1   : > { %v1618_v53 = vmul.f32 %v3175_v24, %v1537_v48  ;;  %v1320_v50 = vpop.f32.mrf.mxu1 }
 0x1d2   : > { %v1730_v51 = vmax.f32 %v1666_v27, 0.0  ;;  %v1321_v54 = vadd.f32 %v1320_v50, %v1151_v8 }
 0x1d3   : > { %v1686_v32 = vadd.f32 %v3183_v16, %v1618_v53 }
 0x1d4   : > { %1794 = vst [vmem:[%s2895_s20 + $0x118] sm:$0xff] %v1730_v51  ;;  %v1490_v61 = vadd.f32 %v1489_v46, %v1321_v54 }
 0x1d5   : > { %v1750_v63 = vmax.f32 %v1686_v32, 0.0 }
 0x1d6   : > { %v1599_v1 = vmul.f32 %v3175_v24, %v1490_v61  ;;  %v1539_v4 = vpop.f32.mrf.mxu3 }
 0x1d7   : > { %1814 = vst [vmem:[%s2895_s20 + $0x1b8] sm:$0xff] %v1750_v63  ;;  %v1540_v0 = vadd.f32 %v1539_v4, %v1371_v2 }
 0x1d8   : > { %v1667_v38 = vadd.f32 %v3183_v16, %v1599_v1  ;;  %v1496_v60 = vpop.f32.mrf.mxu2  ;;  %v1153_v52 = vpop.f32.mrf.mxu0 }
 0x1d9   : > { %v1619_v28 = vmul.f32 %v3175_v24, %v1540_v0  ;;  %v1322_v21 = vpop.f32.mrf.mxu1 }
 0x1da   : > { %v1731_v58 = vmax.f32 %v1667_v38, 0.0  ;;  %v1323_v15 = vadd.f32 %v1322_v21, %v1153_v52 }
 0x1db   : > { %v1687_v46 = vadd.f32 %v3183_v16, %v1619_v28 }
 0x1dc   : > { %1795 = vst [vmem:[%s2895_s20 + $0x120] sm:$0xff] %v1731_v58  ;;  %v1492_v13 = vadd.f32 %v1491_v9, %v1323_v15 }
 0x1dd   : > { %v1751_v19 = vmax.f32 %v1687_v46, 0.0 }
 0x1de   : > { %v1600_v7 = vmul.f32 %v3175_v24, %v1492_v13  ;;  %v1541_v22 = vpop.f32.mrf.mxu3 }
 0x1df   : > { %1815 = vst [vmem:[%s2895_s20 + $0x1c0] sm:$0xff] %v1751_v19  ;;  %v1542_v62 = vadd.f32 %v1541_v22, %v1373_v25 }
 0x1e0   : > { %v1668_v17 = vadd.f32 %v3183_v16, %v1600_v7  ;;  %v1499_v6 = vpop.f32.mrf.mxu2  ;;  %v1156_v31 = vpop.f32.mrf.mxu0 }
 0x1e1   : > { %v1620_v35 = vmul.f32 %v3175_v24, %v1542_v62  ;;  %v1325_v14 = vpop.f32.mrf.mxu1 }
 0x1e2   : > { %v1732_v42 = vmax.f32 %v1668_v17, 0.0  ;;  %v1326_v36 = vadd.f32 %v1325_v14, %v1156_v31 }
 0x1e3   : > { %v1688_v9 = vadd.f32 %v3183_v16, %v1620_v35 }
 0x1e4   : > { %1796 = vst [vmem:[%s2895_s20 + $0x128] sm:$0xff] %v1732_v42  ;;  %v1495_v33 = vadd.f32 %v1494_v30, %v1326_v36 }
 0x1e5   : > { %v1752_v39 = vmax.f32 %v1688_v9, 0.0 }
 0x1e6   : > { %v1601_v40 = vmul.f32 %v3175_v24, %v1495_v33  ;;  %v1544_v44 = vpop.f32.mrf.mxu3 }
 0x1e7   : > { %1816 = vst [vmem:[%s2895_s20 + $0x1c8] sm:$0xff] %v1752_v39  ;;  %v1545_v48 = vadd.f32 %v1544_v44, %v1376_v45 }
 0x1e8   : > { %v1669_v27 = vadd.f32 %v3183_v16, %v1601_v40  ;;  %v1501_v8 = vpop.f32.mrf.mxu2  ;;  %v1158_v53 = vpop.f32.mrf.mxu0 }
 0x1e9   : > { %v1621_v50 = vmul.f32 %v3175_v24, %v1545_v48  ;;  %v1327_v51 = vpop.f32.mrf.mxu1 }
 0x1ea   : > { %v1733_v54 = vmax.f32 %v1669_v27, 0.0  ;;  %v1328_v32 = vadd.f32 %v1327_v51, %v1158_v53 }
 0x1eb   : > { %v1689_v30 = vadd.f32 %v3183_v16, %v1621_v50 }
 0x1ec   : > { %1797 = vst [vmem:[%s2895_s20 + $0x130] sm:$0xff] %v1733_v54  ;;  %v1497_v47 = vadd.f32 %v1496_v60, %v1328_v32 }
 0x1ed   : > { %v1753_v61 = vmax.f32 %v1689_v30, 0.0 }
 0x1ee   : > { %v1602_v2 = vmul.f32 %v3175_v24, %v1497_v47  ;;  %v1546_v63 = vpop.f32.mrf.mxu3 }
 0x1ef   : > { %1817 = vst [vmem:[%s2895_s20 + $0x1d0] sm:$0xff] %v1753_v61  ;;  %v1547_v1 = vadd.f32 %v1546_v63, %v1378_v10 }
 0x1f0   : > { %v1670_v4 = vadd.f32 %v3183_v16, %v1602_v2  ;;  %v1504_v0 = vpop.f32.mrf.mxu2  ;;  %v1161_v38 = vpop.f32.mrf.mxu0 }
 0x1f1   : > { %v1622_v52 = vmul.f32 %v3175_v24, %v1547_v1  ;;  %v1330_v28 = vpop.f32.mrf.mxu1 }
 0x1f2   : > { %v1734_v21 = vmax.f32 %v1670_v4, 0.0  ;;  %v1331_v58 = vadd.f32 %v1330_v28, %v1161_v38 }
 0x1f3   : > { %v1690_v60 = vadd.f32 %v3183_v16, %v1622_v52 }
 0x1f4   : > { %1798 = vst [vmem:[%s2895_s20 + $0x138] sm:$0xff] %v1734_v21  ;;  %v1500_v3 = vadd.f32 %v1499_v6, %v1331_v58 }
 0x1f5   : > { %v1754_v15 = vmax.f32 %v1690_v60, 0.0 }
 0x1f6   : > { %v1603_v46 = vmul.f32 %v3175_v24, %v1500_v3  ;;  %v1549_v13 = vpop.f32.mrf.mxu3 }
 0x1f7   : > { %1818 = vst [vmem:[%s2895_s20 + $0x1d8] sm:$0xff] %v1754_v15  ;;  %v1550_v25 = vadd.f32 %v1549_v13, %v1381_v23 }
 0x1f8   : > { %v1671_v19 = vadd.f32 %v3183_v16, %v1603_v46  ;;  %v1506_v7 = vpop.f32.mrf.mxu2  ;;  %v1163_v22 = vpop.f32.mrf.mxu0 }
 0x1f9   : > { %v1623_v62 = vmul.f32 %v3175_v24, %v1550_v25  ;;  %v1332_v17 = vpop.f32.mrf.mxu1 }
 0x1fa   : > { %v1735_v31 = vmax.f32 %v1671_v19, 0.0  ;;  %v1333_v35 = vadd.f32 %v1332_v17, %v1163_v22 }
 0x1fb   : > { %v1691_v6 = vadd.f32 %v3183_v16, %v1623_v62 }
 0x1fc   : > { %1799 = vst [vmem:[%s2895_s20 + $0x140] sm:$0xff] %v1735_v31  ;;  %v1502_v20 = vadd.f32 %v1501_v8, %v1333_v35 }
 0x1fd   : > { %v1755_v14 = vmax.f32 %v1691_v6, 0.0  ;;  %v1351_v6 = vadd.f32 %v3044_v34, %v2889_v11  ;;  %v1353_v11 = vadd.f32 %v3058_v57, %v2905_v29  ;;  %v1356_v57 = vadd.f32 %v3064_v12, %v2910_v41 }
 0x1fe   : > { %v1604_v42 = vmul.f32 %v3175_v24, %v1502_v20  ;;  %v1551_v36 = vpop.f32.mrf.mxu3 }
 0x1ff   : > { %1819 = vst [vmem:[%s2895_s20 + $0x1e0] sm:$0xff] %v1755_v14  ;;  %v1552_v9 = vadd.f32 %v1551_v36, %v1383_v55 }
 0x200   : > { %v1672_v33 = vadd.f32 %v3183_v16, %v1604_v42  ;;  %v1509_v45 = vpop.f32.mrf.mxu2  ;;  %v1166_v39 = vpop.f32.mrf.mxu0 }
 0x201   : > { %v1624_v40 = vmul.f32 %v3175_v24, %v1552_v9  ;;  %v1335_v44 = vpop.f32.mrf.mxu1 }
 0x202   : > { %v1736_v48 = vmax.f32 %v1672_v33, 0.0  ;;  %v1336_v27 = vadd.f32 %v1335_v44, %v1166_v39 }
 0x203   : > { %v1692_v8 = vadd.f32 %v3183_v16, %v1624_v40 }
 0x204   : > { %1800 = vst [vmem:[%s2895_s20 + $0x148] sm:$0xff] %v1736_v48  ;;  %v1505_v43 = vadd.f32 %v1504_v0, %v1336_v27 }
 0x205   : > { %v1756_v53 = vmax.f32 %v1692_v8, 0.0 }
 0x206   : > { %v1605_v50 = vmul.f32 %v3175_v24, %v1505_v43  ;;  %v1554_v51 = vpop.f32.mrf.mxu3 }
 0x207   : > { %1820 = vst [vmem:[%s2895_s20 + $0x1e8] sm:$0xff] %v1756_v53  ;;  %v1555_v54 = vadd.f32 %v1554_v51, %v1386_v26 }
 0x208   : > { %v1673_v32 = vadd.f32 %v3183_v16, %v1605_v50  ;;  %v1511_v30 = vpop.f32.mrf.mxu2  ;;  %v1168_v47 = vpop.f32.mrf.mxu0 }
 0x209   : > { %v1625_v10 = vmul.f32 %v3175_v24, %v1555_v54  ;;  %v1337_v61 = vpop.f32.mrf.mxu1 }
 0x20a   : > { %v1737_v2 = vmax.f32 %v1673_v32, 0.0  ;;  %v1338_v63 = vadd.f32 %v1337_v61, %v1168_v47 }
 0x20b   : > { %v1693_v1 = vadd.f32 %v3183_v16, %v1625_v10 }
 0x20c   : > { %1801 = vst [vmem:[%s2895_s20 + $0x150] sm:$0xff] %v1737_v2  ;;  %v1507_v56 = vadd.f32 %v1506_v7, %v1338_v63 }
 0x20d   : > { %v1757_v4 = vmax.f32 %v1693_v1, 0.0 }
 0x20e   : > { %v1606_v0 = vmul.f32 %v3175_v24, %v1507_v56  ;;  %v1556_v38 = vpop.f32.mrf.mxu3  ;;  %v1358_v56 = vadd.f32 %v3078_v37, %v2924_v59 }
 0x20f   : > { %1821 = vst [vmem:[%s2895_s20 + $0x1f0] sm:$0xff] %v1757_v4  ;;  %v1557_v52 = vadd.f32 %v1556_v38, %v1388_v49 }
 0x210   : > { %v1674_v28 = vadd.f32 %v3183_v16, %v1606_v0  ;;  %v1514_v21 = vpop.f32.mrf.mxu2  ;;  %v1171_v58 = vpop.f32.mrf.mxu0 }
 0x211   : > { %v1626_v60 = vmul.f32 %v3175_v24, %v1557_v52  ;;  %v1340_v3 = vpop.f32.mrf.mxu1 }
 0x212   : > { %v1738_v23 = vmax.f32 %v1674_v28, 0.0  ;;  %v1341_v15 = vadd.f32 %v1340_v3, %v1171_v58 }
 0x213   : > { %v1694_v46 = vadd.f32 %v3183_v16, %v1626_v60 }
 0x214   : > { %1802 = vst [vmem:[%s2895_s20 + $0x158] sm:$0xff] %v1738_v23  ;;  %v1510_v18 = vadd.f32 %v1509_v45, %v1341_v15 }
 0x215   : > { %v1758_v5 = vmax.f32 %v1694_v46, 0.0 }
 0x216   : > { %v1607_v13 = vmul.f32 %v3175_v24, %v1510_v18 }
 0x217   : > { %1822 = vst [vmem:[%s2895_s20 + $0x1f8] sm:$0xff] %v1758_v5 }
 0x218   : > { %v1675_v25 = vadd.f32 %v3183_v16, %v1607_v13  ;;  %v1516_v19 = vpop.f32.mrf.mxu2  ;;  %v1173_v7 = vpop.f32.mrf.mxu0 }
 0x219   : > { %v1342_v22 = vpop.f32.mrf.mxu1 }
 0x21a   : > { %v1739_v62 = vmax.f32 %v1675_v25, 0.0  ;;  %v1343_v17 = vadd.f32 %v1342_v22, %v1173_v7 }
 0x21c   : > { %1803 = vst [vmem:[%s2895_s20 + $0x160] sm:$0xff] %v1739_v62  ;;  %v1512_v31 = vadd.f32 %v1511_v30, %v1343_v17 }
 0x21e   : > { %v1608_v35 = vmul.f32 %v3175_v24, %v1512_v31 }
 0x220   : > { %v1676_v20 = vadd.f32 %v3183_v16, %v1608_v35  ;;  %v1519_v55 = vpop.f32.mrf.mxu2  ;;  %v1176_v14 = vpop.f32.mrf.mxu0 }
 0x221   : > { %v1520_v42 = vadd.f32 %v1519_v55, %v1351_v6  ;;  %v1345_v36 = vpop.f32.mrf.mxu1 }
 0x222   : > { %v1740_v9 = vmax.f32 %v1676_v20, 0.0  ;;  %v1346_v33 = vadd.f32 %v1345_v36, %v1176_v14 }
 0x223   : > { %v1611_v45 = vmul.f32 %v3175_v24, %v1520_v42 }
 0x224   : > { %1804 = vst [vmem:[%s2895_s20 + $0x168] sm:$0xff] %v1740_v9  ;;  %v1515_v39 = vadd.f32 %v1514_v21, %v1346_v33 }
 0x225   : > { %v1679_v40 = vadd.f32 %v3183_v16, %v1611_v45 }
 0x226   : > { %v1609_v44 = vmul.f32 %v3175_v24, %v1515_v39 }
 0x227   : > { %v1743_v34 = vmax.f32 %v1679_v40, 0.0 }
 0x228   : > { %v1677_v48 = vadd.f32 %v3183_v16, %v1609_v44  ;;  %v1521_v27 = vpop.f32.mrf.mxu2  ;;  %v1178_v8 = vpop.f32.mrf.mxu0 }
 0x229   : > { %1807 = vst [vmem:[%s2895_s20 + $0x180] sm:$0xff] %v1743_v34  ;;  %v1522_v43 = vadd.f32 %v1521_v27, %v1353_v11  ;;  %v1347_v26 = vpop.f32.mrf.mxu1 }
 0x22a   : > { %v1741_v53 = vmax.f32 %v1677_v48, 0.0  ;;  %v1348_v50 = vadd.f32 %v1347_v26, %v1178_v8 }
 0x22b   : > { %v1612_v51 = vmul.f32 %v3175_v24, %v1522_v43 }
 0x22c   : > { %1805 = vst [vmem:[%s2895_s20 + $0x170] sm:$0xff] %v1741_v53  ;;  %v1517_v54 = vadd.f32 %v1516_v19, %v1348_v50 }
 0x22d   : > { %v1680_v32 = vadd.f32 %v3183_v16, %v1612_v51 }
 0x22e   : > { %v1610_v29 = vmul.f32 %v3175_v24, %v1517_v54 }
 0x22f   : > { %v1744_v30 = vmax.f32 %v1680_v32, 0.0 }
 0x230   : > { %v1678_v47 = vadd.f32 %v3183_v16, %v1610_v29  ;;  %v1524_v10 = vpop.f32.mrf.mxu2 }
 0x231   : > { %1808 = vst [vmem:[%s2895_s20 + $0x188] sm:$0xff] %v1744_v30  ;;  %v1525_v61 = vadd.f32 %v1524_v10, %v1356_v57 }
 0x232   : > { %v1742_v2 = vmax.f32 %v1678_v47, 0.0 }
 0x233   : > { %v1613_v63 = vmul.f32 %v3175_v24, %v1525_v61 }
 0x234   : > { %1806 = vst [vmem:[%s2895_s20 + $0x178] sm:$0xff] %v1742_v2 }
 0x235   : > { %v1681_v1 = vadd.f32 %v3183_v16, %v1613_v63 }
 0x237   : > { %v1745_v41 = vmax.f32 %v1681_v1, 0.0 }
 0x238   : > { %v1526_v12 = vpop.f32.mrf.mxu2 }
 0x239   : > { %1809 = vst [vmem:[%s2895_s20 + $0x190] sm:$0xff] %v1745_v41  ;;  %v1527_v49 = vadd.f32 %v1526_v12, %v1358_v56 }
 0x23b   : > { %v1614_v4 = vmul.f32 %v3175_v24, %v1527_v49 }
 0x23d   : > { %v1682_v0 = vadd.f32 %v3183_v16, %v1614_v4 }
 0x23f   : > { %v1746_v38 = vmax.f32 %v1682_v0, 0.0 }
 0x241   : > { %1810 = vst [vmem:[%s2895_s20 + $0x198] sm:$0xff] %v1746_v38 }
 0x242   : > { %2607 = shalt.err (!%p2604_p3)
}
 0x243   : > { %s2644_s11 = smov 128   ;;  %s2645_s20 = smov 8  }
 0x244   : > { %2535 = dma.vmem_to_hbm [thread:$0]  (%p2709_p5), %s1837_s7, 8192, %s1839_s8, %s1824_s19, %s2644_s11, %s2644_s11, %s2645_s20  }
 0x245 PF: > { %p2541_p4 = scmp.ge.s32.totalorder %s2642_s18, 2  ;;  %s1853_s27 = sand.u32 1, %s2630_s15  }
 0x246   : > { %s1854_s28 = scalar_lea.sflag [#allocation3], %s1853_s27 }
 0x247   : > { %p2538_p7 = pnand %p2541_p4, %p2713_p6 }
 0x249   : > { %p2539_p8 = pneg %p2538_p7 }
 0x24b   : > { %2625 = dma.done.wait (%p2539_p8), %s1854_s28, 8192  }
 0x24c   : > { %2627 = vsyncadd (%p2539_p8), %s1854_s28, 4294959104  ;;  %p14_p9 = scmp.ge.s32.totalorder %s2696_s21, 6   ;;  %s3369_s15 = smov %s2634_s16 }
 0x24d   : > { %s3370_s16 = smov %s2638_s17  ;;  %s3371_s17 = smov %s2707_s24 }
 0x24e   : > { %s3372_s18 = smov %s2696_s21  ;;  %16 = sbr.rel (!%p14_p9) target bundleno = 3 (0x3), region = 71 }
 0x253   :  { %1860 = vsyncpa [#allocation3], 1 }
 0x254   :  { %1862 = vsyncpa [#allocation3 + $0x1], 1 }

</bundles_post_ra>
